<compile_context>
chip_gen: v7x
topology: tpu7x:2x2x1
jax: 0.10.0
libtpu: 0.0.40
codegen_flags: <defaults>
</compile_context>

<pallas_src>
import functools

import jax
import jax.numpy as jnp
from jax.experimental import pallas as pl
from jax.experimental.pallas import tpu as pltpu

_P = 4  # points packed per row: C=32 channels/point -> 4*32 = 128 lanes (full vreg row)


def _binary_cellnet_kernel(pc_ref, w1_ref, b1_ref, w2_ref, b2_ref,
                           wlt_ref, bl_ref, out_ref):
    """One tile = tile_rows packed rows = _P * tile_rows points.

    pc_ref : (tile_rows, _P*(4+F)) f32   packed point tile (coords + feats, _P pts/row)
    w1_ref : (_P*(4+F), _P*C)      bf16  block-diag layer-1 weights, coord rows zeroed
    b1_ref : (1, _P*C)             f32   layer-1 bias, tiled per packed point
    w2_ref : (_P*C, _P*C)          bf16  block-diag layer-2 weights
    b2_ref : (1, _P*C)             f32
    wlt_ref: (8, _P*C)             bf16  block-diag head wl^T (rows _P..7 zero)
    bl_ref : (1,)                  f32   head bias (SMEM scalar)
    out_ref: (1, _P, tile_rows)    f32   sigmoid for point j of packed row r -> [0, j, r]
    """
    p = out_ref.shape[1]

    # ---- layer 1 (F -> C per point): one lane-dense MXU matmul ---------------
    # Coord columns hit zero rows of w1_ref, so they never contribute.
    h = jnp.dot(pc_ref[...].astype(jnp.bfloat16), w1_ref[...],
                preferred_element_type=jnp.float32) + b1_ref[...]
    h = jnp.maximum(h, 0.0)                              # (tile_rows, _P*C) f32

    # ---- layer 2 (C -> C per point): block-diagonal 128x128 MXU matmul -------
    h = jnp.dot(h.astype(jnp.bfloat16), w2_ref[...],
                preferred_element_type=jnp.float32) + b2_ref[...]
    h = jnp.maximum(h, 0.0)                              # (tile_rows, _P*C) f32

    # ---- head: Linear(C, 1) + sigmoid (exact module semantics) ---------------
    # z^T = Wl_bd^T @ h^T -> packed rows land on the lane axis (lane-dense store).
    zt = jax.lax.dot_general(
        wlt_ref[...], h.astype(jnp.bfloat16),
        dimension_numbers=(((1,), (1,)), ((), ())),      # A @ B^T
        preferred_element_type=jnp.float32)              # (8, tile_rows)
    out_ref[...] = jax.nn.sigmoid(zt + bl_ref[0])[None, 0:p, :]


@functools.partial(jax.jit, static_argnames=("tile_n",))
def binary_sparse_cellnet_forward(point_cloud, params, tile_n=8192):
    """point_cloud: (1, N, 4 + F) float32  ->  (1, N, 1) float32."""
    pc = jnp.squeeze(point_cloud, axis=0).astype(jnp.float32)    # (N, 4 + F)
    N, ncols = pc.shape
    assert ncols > 4, "need at least one feature column after the 4 coord cols"

    w1, b1, w2, b2, wl, bl = params
    F = w1.shape[0]
    C = w1.shape[1]
    assert F == ncols - 4
    assert tile_n >= 512 and tile_n % 512 == 0

    # --- effective tile size: big tiles amortize ~0.35us/step grid overhead,
    #     but cap at N/2 so a >=2-step grid lets v7x shard across both TCs. ----
    half = ((N // 2) // 512) * 512
    tile_n_eff = min(tile_n, half) if half >= 512 else 512
    tile_rows = tile_n_eff // _P                                  # multiple of 128

    # --- pack _P points per row (contiguous reshape, metadata-only). ----------
    if N % _P != 0:                                               # tiny tail pad only
        pc = jnp.pad(pc, ((0, _P - N % _P), (0, 0)))
    rows = pc.shape[0] // _P
    pc_packed = pc.reshape(rows, _P * ncols)

    num_tiles = pl.cdiv(rows, tile_rows)
    # NOTE: no whole-array padding for ragged N — the last (edge) block reads a
    # bounds-clamped tile whose trailing rows are stale; those per-point garbage
    # outputs are discarded by the final [:N] slice (all ops are strictly per-row).

    # --- tiny parameter prep: block-diagonal packed weights / tiled biases. ---
    eye_p = jnp.eye(_P, dtype=jnp.float32)
    w1_pad = jnp.concatenate(
        [jnp.zeros((4, C), jnp.float32), w1.astype(jnp.float32)], axis=0)  # (ncols, C)
    w1_bd = jnp.kron(eye_p, w1_pad).astype(jnp.bfloat16)           # (_P*ncols, _P*C)
    w2_bd = jnp.kron(eye_p, w2.astype(jnp.float32)).astype(jnp.bfloat16)   # (_P*C, _P*C)
    b1_t = jnp.tile(b1.reshape(1, C).astype(jnp.float32), (1, _P))         # (1, _P*C)
    b2_t = jnp.tile(b2.reshape(1, C).astype(jnp.float32), (1, _P))         # (1, _P*C)
    wlt_bd = jnp.kron(eye_p, wl.reshape(C, 1).T.astype(jnp.float32))       # (_P, _P*C)
    wlt_bd = jnp.pad(wlt_bd, ((0, 8 - _P), (0, 0))).astype(jnp.bfloat16)   # (8, _P*C)
    bl_s = bl.reshape((1,)).astype(jnp.float32)                   # scalar, SMEM

    pc_cols = _P * ncols
    cc = _P * C

    out = pl.pallas_call(
        _binary_cellnet_kernel,
        out_shape=jax.ShapeDtypeStruct((num_tiles, _P, tile_rows), jnp.float32),
        grid_spec=pltpu.PrefetchScalarGridSpec(
            num_scalar_prefetch=0,
            grid=(num_tiles,),
            in_specs=[
                pl.BlockSpec((tile_rows, pc_cols), lambda i: (i, 0)),  # packed point tile
                pl.BlockSpec((pc_cols, cc), lambda i: (0, 0)),         # W1_bd (resident)
                pl.BlockSpec((1, cc), lambda i: (0, 0)),               # b1    (resident)
                pl.BlockSpec((cc, cc), lambda i: (0, 0)),              # W2_bd (resident)
                pl.BlockSpec((1, cc), lambda i: (0, 0)),               # b2    (resident)
                pl.BlockSpec((8, cc), lambda i: (0, 0)),               # wl^T block-diag
                pl.BlockSpec(memory_space=pltpu.MemorySpace.SMEM),     # bl scalar
            ],
            out_specs=pl.BlockSpec((1, _P, tile_rows), lambda i: (i, 0, 0)),
        ),
        compiler_params=pltpu.CompilerParams(
            dimension_semantics=("parallel",)),
    )(pc_packed, w1_bd, b1_t, w2_bd, b2_t, wlt_bd, bl_s)

    # out[t, j, r] holds point t*tile_n_eff + _P*r + j; un-interleave the tiny
    # output slab with a cheap wrapper transpose, then drop padded/ragged rows.
    out = jnp.transpose(out, (0, 2, 1)).reshape(-1)[:N]
    return out.reshape(1, N, 1)                                    # (1, N, 1)


def init_params(key, in_features, n_channels):
    """Deterministic PyTorch-style uniform(-1/sqrt(fan_in), 1/sqrt(fan_in)) init."""
    ks = jax.random.split(key, 6)

    def u(k, shape, fan_in):
        bound = 1.0 / jnp.sqrt(jnp.float32(fan_in))
        return jax.random.uniform(k, shape, jnp.float32, -bound, bound)

    w1 = u(ks[0], (in_features, n_channels), in_features)
    b1 = u(ks[1], (1, n_channels), in_features)
    w2 = u(ks[2], (n_channels, n_channels), n_channels)
    b2 = u(ks[3], (1, n_channels), n_channels)
    wl = u(ks[4], (n_channels, 1), n_channels)
    bl = u(ks[5], (1, 1), n_channels)
    return (w1, b1, w2, b2, wl, bl)


def _reference_forward(point_cloud, params):
    """Pure-JAX f32 reference for a correctness sanity check."""
    pc = jnp.squeeze(point_cloud, axis=0)
    feats = pc[:, 4:].astype(jnp.float32)
    w1, b1, w2, b2, wl, bl = params
    h = jnp.maximum(feats @ w1 + b1, 0.0)
    h = jnp.maximum(h @ w2 + b2, 0.0)
    z = h @ wl + bl
    return jax.nn.sigmoid(z)[None, :, :]


if __name__ == "__main__":
    N_POINTS = 2048         # number of sparse points (-> 2 grid steps after auto-cap)
    IN_FEATURES = 4         # per-point input feature dim (columns 4:)
    N_CHANNELS = 32         # nChannels of the cell net / linear head input

    key = jax.random.PRNGKey(0)
    k_coords, k_feats = jax.random.split(key)

    coords = jax.random.randint(k_coords, (1, N_POINTS, 4), 0, 16).astype(jnp.float32)
    feats = jax.random.normal(k_feats, (1, N_POINTS, IN_FEATURES), jnp.float32)
    point_cloud = jnp.concatenate([coords, feats], axis=-1)       # (1, N, 4 + F)

    params = init_params(jax.random.PRNGKey(42), IN_FEATURES, N_CHANNELS)

    out = binary_sparse_cellnet_forward(point_cloud, params)
    out = jax.block_until_ready(out)

    ref = jax.block_until_ready(_reference_forward(point_cloud, params))
    assert out.shape == (1, N_POINTS, 1), out.shape
    # bf16 MXU matmuls (f32 accumulation) vs the pure-f32 reference.
    assert jnp.max(jnp.abs(out - ref)) < 1e-2

    print("KERNEL_OK")
</pallas_src>

<mosaic_0001>
module attributes {stable_mosaic.version = 11 : i64} {
  func.func @_binary_cellnet_kernel(%arg0: i32, %arg1: memref<256x32xf32, #tpu.memory_space<vmem>>, %arg2: memref<32x128xbf16, #tpu.memory_space<vmem>>, %arg3: memref<1x128xf32, #tpu.memory_space<vmem>>, %arg4: memref<128x128xbf16, #tpu.memory_space<vmem>>, %arg5: memref<1x128xf32, #tpu.memory_space<vmem>>, %arg6: memref<8x128xbf16, #tpu.memory_space<vmem>>, %arg7: memref<1xf32, #tpu.memory_space<smem>>, %arg8: memref<1x4x256xf32, #tpu.memory_space<vmem>>) attributes {dimension_semantics = [#tpu.dimension_semantics<parallel>], iteration_bounds = array<i64: 2>, scalar_prefetch = 0 : i64, scratch_operands = 0 : i64, tpu.core_type = #tpu.core_type<tc>, window_params = [{transform_indices = @transform_0, window_bounds = array<i64: 256, 32>}, {pipeline_mode = #tpu.pipeline_mode<synchronous>, transform_indices = @transform_1, window_bounds = array<i64: 32, 128>}, {pipeline_mode = #tpu.pipeline_mode<synchronous>, transform_indices = @transform_2, window_bounds = array<i64: 1, 128>}, {pipeline_mode = #tpu.pipeline_mode<synchronous>, transform_indices = @transform_3, window_bounds = array<i64: 128, 128>}, {pipeline_mode = #tpu.pipeline_mode<synchronous>, transform_indices = @transform_4, window_bounds = array<i64: 1, 128>}, {pipeline_mode = #tpu.pipeline_mode<synchronous>, transform_indices = @transform_5, window_bounds = array<i64: 8, 128>}, {transform_indices = @transform_6, window_bounds = array<i64: 1>}, {transform_indices = @transform_7, window_bounds = array<i64: 1, 4, 256>}]} {
    %c0 = arith.constant 0 : index
    %c0_0 = arith.constant 0 : index
    %0 = vector.load %arg1[%c0, %c0_0] : memref<256x32xf32, #tpu.memory_space<vmem>>, vector<256x32xf32>
    %1 = arith.truncf %0 : vector<256x32xf32> to vector<256x32xbf16>
    %c0_1 = arith.constant 0 : index
    %c0_2 = arith.constant 0 : index
    %2 = vector.load %arg2[%c0_1, %c0_2] : memref<32x128xbf16, #tpu.memory_space<vmem>>, vector<32x128xbf16>
    %cst = arith.constant dense<0.000000e+00> : vector<256x128xf32>
    %3 = tpu.matmul %1, %2, %cst {dimension_numbers = #tpu.dot_dimension_numbers<[1], [0], [0], [1], [0, 0, 1, 1], [], []>} : vector<256x32xbf16>, vector<32x128xbf16>, vector<256x128xf32> -> vector<256x128xf32>
    %c0_3 = arith.constant 0 : index
    %c0_4 = arith.constant 0 : index
    %4 = vector.load %arg3[%c0_3, %c0_4] : memref<1x128xf32, #tpu.memory_space<vmem>>, vector<1x128xf32>
    %5 = vector.broadcast %4 : vector<1x128xf32> to vector<256x128xf32>
    %6 = arith.addf %3, %5 : vector<256x128xf32>
    %cst_5 = arith.constant 0.000000e+00 : f32
    %7 = vector.broadcast %cst_5 : f32 to vector<256x128xf32>
    %8 = arith.maximumf %6, %7 : vector<256x128xf32>
    %9 = arith.truncf %8 : vector<256x128xf32> to vector<256x128xbf16>
    %c0_6 = arith.constant 0 : index
    %c0_7 = arith.constant 0 : index
    %10 = vector.load %arg4[%c0_6, %c0_7] : memref<128x128xbf16, #tpu.memory_space<vmem>>, vector<128x128xbf16>
    %cst_8 = arith.constant dense<0.000000e+00> : vector<256x128xf32>
    %11 = tpu.matmul %9, %10, %cst_8 {dimension_numbers = #tpu.dot_dimension_numbers<[1], [0], [0], [1], [0, 0, 1, 1], [], []>} : vector<256x128xbf16>, vector<128x128xbf16>, vector<256x128xf32> -> vector<256x128xf32>
    %c0_9 = arith.constant 0 : index
    %c0_10 = arith.constant 0 : index
    %12 = vector.load %arg5[%c0_9, %c0_10] : memref<1x128xf32, #tpu.memory_space<vmem>>, vector<1x128xf32>
    %13 = vector.broadcast %12 : vector<1x128xf32> to vector<256x128xf32>
    %14 = arith.addf %11, %13 : vector<256x128xf32>
    %cst_11 = arith.constant 0.000000e+00 : f32
    %15 = vector.broadcast %cst_11 : f32 to vector<256x128xf32>
    %16 = arith.maximumf %14, %15 : vector<256x128xf32>
    %c0_12 = arith.constant 0 : index
    %c0_13 = arith.constant 0 : index
    %17 = vector.load %arg6[%c0_12, %c0_13] : memref<8x128xbf16, #tpu.memory_space<vmem>>, vector<8x128xbf16>
    %18 = arith.truncf %16 : vector<256x128xf32> to vector<256x128xbf16>
    %cst_14 = arith.constant dense<0.000000e+00> : vector<8x256xf32>
    %19 = tpu.matmul %17, %18, %cst_14 {dimension_numbers = #tpu.dot_dimension_numbers<[1], [1], [0], [0], [0, 0, 1, 0], [], []>} : vector<8x128xbf16>, vector<256x128xbf16>, vector<8x256xf32> -> vector<8x256xf32>
    %c0_15 = arith.constant 0 : index
    %20 = memref.load %arg7[%c0_15] : memref<1xf32, #tpu.memory_space<smem>>
    %21 = vector.broadcast %20 : f32 to vector<8x256xf32>
    %22 = arith.addf %19, %21 : vector<8x256xf32>
    %23 = arith.negf %22 : vector<8x256xf32>
    %24 = math.exp %23 : vector<8x256xf32>
    %cst_16 = arith.constant 1.000000e+00 : f32
    %25 = vector.broadcast %cst_16 : f32 to vector<8x256xf32>
    %26 = arith.addf %25, %24 : vector<8x256xf32>
    %27 = arith.divf %25, %26 : vector<8x256xf32>
    %28 = vector.extract_strided_slice %27 {offsets = [0, 0], sizes = [4, 256], strides = [1, 1]} : vector<8x256xf32> to vector<4x256xf32>
    %29 = vector.shape_cast %28 : vector<4x256xf32> to vector<1x4x256xf32>
    %c0_17 = arith.constant 0 : index
    %c0_18 = arith.constant 0 : index
    %c0_19 = arith.constant 0 : index
    %30 = vector.load %arg8[%c0_17, %c0_18, %c0_19] : memref<1x4x256xf32, #tpu.memory_space<vmem>>, vector<1x4x256xf32>
    tpu.vector_store %arg8[%c0_17, %c0_18, %c0_19], %29 {strides = array<i32>} : memref<1x4x256xf32, #tpu.memory_space<vmem>>, vector<1x4x256xf32>,
    return
  }
  func.func @transform_0(%arg0: i32) -> (i32, i32) {
    %c0_i32 = arith.constant 0 : i32
    %c0_i32_0 = arith.constant 0 : i32
    return %arg0, %c0_i32 : i32, i32
  }
  func.func @transform_1(%arg0: i32) -> (i32, i32) {
    %c0_i32 = arith.constant 0 : i32
    %c0_i32_0 = arith.constant 0 : i32
    %c0_i32_1 = arith.constant 0 : i32
    return %c0_i32, %c0_i32_0 : i32, i32
  }
  func.func @transform_2(%arg0: i32) -> (i32, i32) {
    %c0_i32 = arith.constant 0 : i32
    %c0_i32_0 = arith.constant 0 : i32
    %c0_i32_1 = arith.constant 0 : i32
    return %c0_i32, %c0_i32_0 : i32, i32
  }
  func.func @transform_3(%arg0: i32) -> (i32, i32) {
    %c0_i32 = arith.constant 0 : i32
    %c0_i32_0 = arith.constant 0 : i32
    %c0_i32_1 = arith.constant 0 : i32
    return %c0_i32, %c0_i32_0 : i32, i32
  }
  func.func @transform_4(%arg0: i32) -> (i32, i32) {
    %c0_i32 = arith.constant 0 : i32
    %c0_i32_0 = arith.constant 0 : i32
    %c0_i32_1 = arith.constant 0 : i32
    return %c0_i32, %c0_i32_0 : i32, i32
  }
  func.func @transform_5(%arg0: i32) -> (i32, i32) {
    %c0_i32 = arith.constant 0 : i32
    %c0_i32_0 = arith.constant 0 : i32
    %c0_i32_1 = arith.constant 0 : i32
    return %c0_i32, %c0_i32_0 : i32, i32
  }
  func.func @transform_6(%arg0: i32) -> i32 {
    %c0_i32 = arith.constant 0 : i32
    %c0_i32_0 = arith.constant 0 : i32
    return %c0_i32 : i32
  }
  func.func @transform_7(%arg0: i32) -> (i32, i32, i32) {
    %c0_i32 = arith.constant 0 : i32
    %c0_i32_0 = arith.constant 0 : i32
    %c0_i32_1 = arith.constant 0 : i32
    return %arg0, %c0_i32, %c0_i32_0 : i32, i32, i32
  }
}

</mosaic_0001>

<bundles_post_ra>
// kernel: squeeze.1
= control target key start
LH: loop header
LB: loop body
LE: loop exit
PB: predicated region body
PF: predicated region fallthrough
CT: control target
= control target key end

     0   :  { %s2171_s10 = smov 24   ;;  %vm3_vm0 = vcmask 64512   ;;  %vm324_vm1 = vcmask 261312   ;;  %s2172_s18 = smov 16   ;;  %vm771_vm2 = vcmask 195712   ;;  %vm1218_vm3 = vcmask 130112   ;;  %s4168_s0 = inlined_call_operand.vmem [shape: f32[1,2048,8], index: 0, kind: input, shape index: {}]   ;;  %s4169_s1 = inlined_call_operand.vmem [shape: f32[512,32], index: 1, kind: output, shape index: {}]  }
   0x1   :  { %v1790_v0 = vld [vmem:[%s4168_s0 + $0x103] ss:$4 sm:$0xff]   ;;  %v1675_v12 = vld [vmem:[%s4168_s0 + $0x100] ss:$4 sm:$0xff]   ;;  %s2173_s22 = smov 8  }
   0x2   :  { %v1787_v1 = vld [vmem:[%s4168_s0 + $0x3] ss:$4 sm:$0xff]   ;;  %335 = vrot.lane.b32.xlu1 %v1790_v0, %s2171_s10  ;;  %v2_v13 = vld [vmem:[%s4168_s0] ss:$4 sm:$0xff]   ;;  %1676 = vst.msk [vmem:[%s4169_s1 + $0x40] sm:$0xff] %vm3_vm0, %v1675_v12  }
   0x3   :  { %322 = vrot.lane.b32.xlu0 %v1787_v1, %s2171_s10  ;;  %v1792_v2 = vld [vmem:[%s4168_s0 + $0x183] ss:$4 sm:$0xff]   ;;  %4 = vst.msk [vmem:[%s4169_s1] sm:$0xff] %vm3_vm0, %v2_v13   ;;  %v1683_v16 = vld [vmem:[%s4168_s0 + $0x180] ss:$4 sm:$0xff]  }
   0x4   :  { %v1788_v3 = vld [vmem:[%s4168_s0 + $0x83] ss:$4 sm:$0xff]   ;;  %1684 = vst.msk [vmem:[%s4169_s1 + $0x60] sm:$0xff] %vm3_vm0, %v1683_v16   ;;  %v1667_v17 = vld [vmem:[%s4168_s0 + $0x80] ss:$4 sm:$0xff]  }
   0x5   :  { %v1796_v4 = vld [vmem:[%s4168_s0 + $0x283] ss:$4 sm:$0xff]   ;;  %1668 = vst.msk [vmem:[%s4169_s1 + $0x20] sm:$0xff] %vm3_vm0, %v1667_v17   ;;  %v1699_v18 = vld [vmem:[%s4168_s0 + $0x280] ss:$4 sm:$0xff]  }
   0x6   :  { %342 = vrot.lane.b32.xlu1 %v1792_v2, %s2171_s10  ;;  %v1794_v5 = vld [vmem:[%s4168_s0 + $0x203] ss:$4 sm:$0xff]   ;;  %v1691_v19 = vld [vmem:[%s4168_s0 + $0x200] ss:$4 sm:$0xff]   ;;  %1700 = vst.msk [vmem:[%s4169_s1 + $0xa0] sm:$0xff] %vm3_vm0, %v1699_v18  }
   0x7   :  { %328 = vrot.lane.b32.xlu0 %v1788_v3, %s2171_s10  ;;  %v1800_v6 = vld [vmem:[%s4168_s0 + $0x383] ss:$4 sm:$0xff]   ;;  %1692 = vst.msk [vmem:[%s4169_s1 + $0x80] sm:$0xff] %vm3_vm0, %v1691_v19   ;;  %v1715_v20 = vld [vmem:[%s4168_s0 + $0x380] ss:$4 sm:$0xff]  }
   0x8   :  { %v1798_v7 = vld [vmem:[%s4168_s0 + $0x303] ss:$4 sm:$0xff]   ;;  %1716 = vst.msk [vmem:[%s4169_s1 + $0xe0] sm:$0xff] %vm3_vm0, %v1715_v20   ;;  %v1707_v23 = vld [vmem:[%s4168_s0 + $0x300] ss:$4 sm:$0xff]  }
   0x9   :  { %v1804_v8 = vld [vmem:[%s4168_s0 + $0x483] ss:$4 sm:$0xff]   ;;  %1708 = vst.msk [vmem:[%s4169_s1 + $0xc0] sm:$0xff] %vm3_vm0, %v1707_v23   ;;  %v1731_v24 = vld [vmem:[%s4168_s0 + $0x480] ss:$4 sm:$0xff]  }
   0xa   :  { %356 = vrot.lane.b32.xlu1 %v1796_v4, %s2171_s10  ;;  %v1802_v9 = vld [vmem:[%s4168_s0 + $0x403] ss:$4 sm:$0xff]   ;;  %v1723_v25 = vld [vmem:[%s4168_s0 + $0x400] ss:$4 sm:$0xff]   ;;  %1732 = vst.msk [vmem:[%s4169_s1 + $0x120] sm:$0xff] %vm3_vm0, %v1731_v24  }
   0xb   :  { %349 = vrot.lane.b32.xlu0 %v1794_v5, %s2171_s10  ;;  %v1808_v10 = vld [vmem:[%s4168_s0 + $0x583] ss:$4 sm:$0xff]   ;;  %1724 = vst.msk [vmem:[%s4169_s1 + $0x100] sm:$0xff] %vm3_vm0, %v1723_v25   ;;  %v1747_v26 = vld [vmem:[%s4168_s0 + $0x580] ss:$4 sm:$0xff]  }
   0xc   :  { %v1806_v11 = vld [vmem:[%s4168_s0 + $0x503] ss:$4 sm:$0xff]   ;;  %v1739_v27 = vld [vmem:[%s4168_s0 + $0x500] ss:$4 sm:$0xff]   ;;  %1748 = vst.msk [vmem:[%s4169_s1 + $0x160] sm:$0xff] %vm3_vm0, %v1747_v26  }
   0xd   :  { %v1812_v14 = vld [vmem:[%s4168_s0 + $0x683] ss:$4 sm:$0xff]   ;;  %1740 = vst.msk [vmem:[%s4169_s1 + $0x140] sm:$0xff] %vm3_vm0, %v1739_v27   ;;  %v1763_v30 = vld [vmem:[%s4168_s0 + $0x680] ss:$4 sm:$0xff]  }
   0xe   :  { %370 = vrot.lane.b32.xlu1 %v1800_v6, %s2171_s10  ;;  %v1810_v15 = vld [vmem:[%s4168_s0 + $0x603] ss:$4 sm:$0xff]   ;;  %v1755_v31 = vld [vmem:[%s4168_s0 + $0x600] ss:$4 sm:$0xff]   ;;  %1764 = vst.msk [vmem:[%s4169_s1 + $0x1a0] sm:$0xff] %vm3_vm0, %v1763_v30  }
   0xf   :  { %363 = vrot.lane.b32.xlu0 %v1798_v7, %s2171_s10  ;;  %v1816_v21 = vld [vmem:[%s4168_s0 + $0x783] ss:$4 sm:$0xff]   ;;  %1756 = vst.msk [vmem:[%s4169_s1 + $0x180] sm:$0xff] %vm3_vm0, %v1755_v31   ;;  %v1779_v32 = vld [vmem:[%s4168_s0 + $0x780] ss:$4 sm:$0xff]  }
  0x10   :  { %v1814_v22 = vld [vmem:[%s4168_s0 + $0x703] ss:$4 sm:$0xff]   ;;  %v1771_v33 = vld [vmem:[%s4168_s0 + $0x700] ss:$4 sm:$0xff]   ;;  %1780 = vst.msk [vmem:[%s4169_s1 + $0x1e0] sm:$0xff] %vm3_vm0, %v1779_v32  }
  0x11   :  { %v1820_v28 = vld [vmem:[%s4168_s0 + $0xa3] ss:$4 sm:$0xff]   ;;  %1772 = vst.msk [vmem:[%s4169_s1 + $0x1c0] sm:$0xff] %vm3_vm0, %v1771_v33   ;;  %v1669_v34 = vld [vmem:[%s4168_s0 + $0xa0] ss:$4 sm:$0xff]  }
  0x12   :  { %384 = vrot.lane.b32.xlu1 %v1804_v8, %s2171_s10  ;;  %v1818_v29 = vld [vmem:[%s4168_s0 + $0x23] ss:$4 sm:$0xff]   ;;  %1670 = vst.msk [vmem:[%s4169_s1 + $0x28] sm:$0xff] %vm3_vm0, %v1669_v34   ;;  %v1661_v36 = vld [vmem:[%s4168_s0 + $0x20] ss:$4 sm:$0xff]  }
  0x13   :  { %377 = vrot.lane.b32.xlu0 %v1802_v9, %s2171_s10  ;;  %v1824_v35 = vld [vmem:[%s4168_s0 + $0x1a3] ss:$4 sm:$0xff]   ;;  %1662 = vst.msk [vmem:[%s4169_s1 + $0x8] sm:$0xff] %vm3_vm0, %v1661_v36   ;;  %v1685_v38 = vld [vmem:[%s4168_s0 + $0x1a0] ss:$4 sm:$0xff]  }
  0x14   :  { %v1822_v37 = vld [vmem:[%s4168_s0 + $0x123] ss:$4 sm:$0xff]   ;;  %v1677_v39 = vld [vmem:[%s4168_s0 + $0x120] ss:$4 sm:$0xff]   ;;  %1686 = vst.msk [vmem:[%s4169_s1 + $0x68] sm:$0xff] %vm3_vm0, %v1685_v38  }
  0x15   :  { %1678 = vst.msk [vmem:[%s4169_s1 + $0x48] sm:$0xff] %vm3_vm0, %v1677_v39   ;;  %v1701_v40 = vld [vmem:[%s4168_s0 + $0x2a0] ss:$4 sm:$0xff]   ;;  %v1828_v44 = vld [vmem:[%s4168_s0 + $0x2a3] ss:$4 sm:$0xff]  }
  0x16   :  { %398 = vrot.lane.b32.xlu1 %v1808_v10, %s2171_s10  ;;  %1702 = vst.msk [vmem:[%s4169_s1 + $0xa8] sm:$0xff] %vm3_vm0, %v1701_v40   ;;  %v1693_v41 = vld [vmem:[%s4168_s0 + $0x220] ss:$4 sm:$0xff]   ;;  %v1826_v45 = vld [vmem:[%s4168_s0 + $0x223] ss:$4 sm:$0xff]  }
  0x17   :  { %391 = vrot.lane.b32.xlu0 %v1806_v11, %s2171_s10  ;;  %1694 = vst.msk [vmem:[%s4169_s1 + $0x88] sm:$0xff] %vm3_vm0, %v1693_v41   ;;  %v1717_v42 = vld [vmem:[%s4168_s0 + $0x3a0] ss:$4 sm:$0xff]   ;;  %v1832_v50 = vld [vmem:[%s4168_s0 + $0x3a3] ss:$4 sm:$0xff]  }
  0x18   :  { %v1709_v43 = vld [vmem:[%s4168_s0 + $0x320] ss:$4 sm:$0xff]   ;;  %1718 = vst.msk [vmem:[%s4169_s1 + $0xe8] sm:$0xff] %vm3_vm0, %v1717_v42   ;;  %v1830_v51 = vld [vmem:[%s4168_s0 + $0x323] ss:$4 sm:$0xff]  }
  0x19   :  { %1710 = vst.msk [vmem:[%s4169_s1 + $0xc8] sm:$0xff] %vm3_vm0, %v1709_v43   ;;  %v1733_v46 = vld [vmem:[%s4168_s0 + $0x4a0] ss:$4 sm:$0xff]   ;;  %v1836_v54 = vld [vmem:[%s4168_s0 + $0x4a3] ss:$4 sm:$0xff]  }
  0x1a   :  { %412 = vrot.lane.b32.xlu1 %v1812_v14, %s2171_s10  ;;  %1734 = vst.msk [vmem:[%s4169_s1 + $0x128] sm:$0xff] %vm3_vm0, %v1733_v46   ;;  %v1725_v47 = vld [vmem:[%s4168_s0 + $0x420] ss:$4 sm:$0xff]   ;;  %v1834_v55 = vld [vmem:[%s4168_s0 + $0x423] ss:$4 sm:$0xff]  }
  0x1b   :  { %405 = vrot.lane.b32.xlu0 %v1810_v15, %s2171_s10  ;;  %1726 = vst.msk [vmem:[%s4169_s1 + $0x108] sm:$0xff] %vm3_vm0, %v1725_v47   ;;  %v1749_v48 = vld [vmem:[%s4168_s0 + $0x5a0] ss:$4 sm:$0xff]   ;;  %v1840_v58 = vld [vmem:[%s4168_s0 + $0x5a3] ss:$4 sm:$0xff]  }
  0x1c   :  { %v1741_v49 = vld [vmem:[%s4168_s0 + $0x520] ss:$4 sm:$0xff]   ;;  %1750 = vst.msk [vmem:[%s4169_s1 + $0x168] sm:$0xff] %vm3_vm0, %v1749_v48   ;;  %v1838_v59 = vld [vmem:[%s4168_s0 + $0x523] ss:$4 sm:$0xff]  }
  0x1d   :  { %1742 = vst.msk [vmem:[%s4169_s1 + $0x148] sm:$0xff] %vm3_vm0, %v1741_v49   ;;  %v1765_v52 = vld [vmem:[%s4168_s0 + $0x6a0] ss:$4 sm:$0xff]   ;;  %v1844_v62 = vld [vmem:[%s4168_s0 + $0x6a3] ss:$4 sm:$0xff]  }
  0x1e   :  { %426 = vrot.lane.b32.xlu1 %v1816_v21, %s2171_s10  ;;  %v1757_v53 = vld [vmem:[%s4168_s0 + $0x620] ss:$4 sm:$0xff]   ;;  %1766 = vst.msk [vmem:[%s4169_s1 + $0x1a8] sm:$0xff] %vm3_vm0, %v1765_v52   ;;  %v1842_v63 = vld [vmem:[%s4168_s0 + $0x623] ss:$4 sm:$0xff]  }
  0x1f   :  { %419 = vrot.lane.b32.xlu0 %v1814_v22, %s2171_s10  ;;  %1758 = vst.msk [vmem:[%s4169_s1 + $0x188] sm:$0xff] %vm3_vm0, %v1757_v53   ;;  %v1781_v56 = vld [vmem:[%s4168_s0 + $0x7a0] ss:$4 sm:$0xff]   ;;  %v1848_v2 = vld [vmem:[%s4168_s0 + $0x7a3] ss:$4 sm:$0xff]  }
  0x20   :  { %v1773_v57 = vld [vmem:[%s4168_s0 + $0x720] ss:$4 sm:$0xff]   ;;  %1782 = vst.msk [vmem:[%s4169_s1 + $0x1e8] sm:$0xff] %vm3_vm0, %v1781_v56   ;;  %v1846_v3 = vld [vmem:[%s4168_s0 + $0x723] ss:$4 sm:$0xff]  }
  0x21   :  { %1774 = vst.msk [vmem:[%s4169_s1 + $0x1c8] sm:$0xff] %vm3_vm0, %v1773_v57   ;;  %v1671_v60 = vld [vmem:[%s4168_s0 + $0xc0] ss:$4 sm:$0xff]   ;;  %v1852_v6 = vld [vmem:[%s4168_s0 + $0xc3] ss:$4 sm:$0xff]  }
  0x22   :  { %440 = vrot.lane.b32.xlu1 %v1820_v28, %s2171_s10  ;;  %v1663_v61 = vld [vmem:[%s4168_s0 + $0x40] ss:$4 sm:$0xff]   ;;  %1672 = vst.msk [vmem:[%s4169_s1 + $0x30] sm:$0xff] %vm3_vm0, %v1671_v60   ;;  %v1850_v7 = vld [vmem:[%s4168_s0 + $0x43] ss:$4 sm:$0xff]  }
  0x23   :  { %433 = vrot.lane.b32.xlu0 %v1818_v29, %s2171_s10  ;;  %1664 = vst.msk [vmem:[%s4169_s1 + $0x10] sm:$0xff] %vm3_vm0, %v1663_v61   ;;  %v1687_v0 = vld [vmem:[%s4168_s0 + $0x1c0] ss:$4 sm:$0xff]   ;;  %v1856_v10 = vld [vmem:[%s4168_s0 + $0x1c3] ss:$4 sm:$0xff]  }
  0x24   :  { %v1679_v1 = vld [vmem:[%s4168_s0 + $0x140] ss:$4 sm:$0xff]   ;;  %1688 = vst.msk [vmem:[%s4169_s1 + $0x70] sm:$0xff] %vm3_vm0, %v1687_v0   ;;  %v1854_v11 = vld [vmem:[%s4168_s0 + $0x143] ss:$4 sm:$0xff]  }
  0x25   :  { %1680 = vst.msk [vmem:[%s4169_s1 + $0x50] sm:$0xff] %vm3_vm0, %v1679_v1   ;;  %v1703_v4 = vld [vmem:[%s4168_s0 + $0x2c0] ss:$4 sm:$0xff]   ;;  %v1860_v14 = vld [vmem:[%s4168_s0 + $0x2c3] ss:$4 sm:$0xff]  }
  0x26   :  { %454 = vrot.lane.b32.xlu1 %v1824_v35, %s2171_s10  ;;  %v1695_v5 = vld [vmem:[%s4168_s0 + $0x240] ss:$4 sm:$0xff]   ;;  %1704 = vst.msk [vmem:[%s4169_s1 + $0xb0] sm:$0xff] %vm3_vm0, %v1703_v4   ;;  %v1858_v15 = vld [vmem:[%s4168_s0 + $0x243] ss:$4 sm:$0xff]  }
  0x27   :  { %447 = vrot.lane.b32.xlu0 %v1822_v37, %s2171_s10  ;;  %1696 = vst.msk [vmem:[%s4169_s1 + $0x90] sm:$0xff] %vm3_vm0, %v1695_v5   ;;  %v1719_v8 = vld [vmem:[%s4168_s0 + $0x3c0] ss:$4 sm:$0xff]   ;;  %v1864_v18 = vld [vmem:[%s4168_s0 + $0x3c3] ss:$4 sm:$0xff]  }
  0x28   :  { %v1711_v9 = vld [vmem:[%s4168_s0 + $0x340] ss:$4 sm:$0xff]   ;;  %1720 = vst.msk [vmem:[%s4169_s1 + $0xf0] sm:$0xff] %vm3_vm0, %v1719_v8   ;;  %v1862_v19 = vld [vmem:[%s4168_s0 + $0x343] ss:$4 sm:$0xff]  }
  0x29   :  { %1712 = vst.msk [vmem:[%s4169_s1 + $0xd0] sm:$0xff] %vm3_vm0, %v1711_v9   ;;  %v1735_v12 = vld [vmem:[%s4168_s0 + $0x4c0] ss:$4 sm:$0xff]   ;;  %v1868_v22 = vld [vmem:[%s4168_s0 + $0x4c3] ss:$4 sm:$0xff]  }
  0x2a   :  { %468 = vrot.lane.b32.xlu1 %v1828_v44, %s2171_s10  ;;  %v1727_v13 = vld [vmem:[%s4168_s0 + $0x440] ss:$4 sm:$0xff]   ;;  %1736 = vst.msk [vmem:[%s4169_s1 + $0x130] sm:$0xff] %vm3_vm0, %v1735_v12   ;;  %v1866_v23 = vld [vmem:[%s4168_s0 + $0x443] ss:$4 sm:$0xff]  }
  0x2b   :  { %461 = vrot.lane.b32.xlu0 %v1826_v45, %s2171_s10  ;;  %1728 = vst.msk [vmem:[%s4169_s1 + $0x110] sm:$0xff] %vm3_vm0, %v1727_v13   ;;  %v1751_v16 = vld [vmem:[%s4168_s0 + $0x5c0] ss:$4 sm:$0xff]   ;;  %v1872_v26 = vld [vmem:[%s4168_s0 + $0x5c3] ss:$4 sm:$0xff]  }
  0x2c   :  { %v1743_v17 = vld [vmem:[%s4168_s0 + $0x540] ss:$4 sm:$0xff]   ;;  %1752 = vst.msk [vmem:[%s4169_s1 + $0x170] sm:$0xff] %vm3_vm0, %v1751_v16   ;;  %v1870_v27 = vld [vmem:[%s4168_s0 + $0x543] ss:$4 sm:$0xff]  }
  0x2d   :  { %1744 = vst.msk [vmem:[%s4169_s1 + $0x150] sm:$0xff] %vm3_vm0, %v1743_v17   ;;  %v1767_v20 = vld [vmem:[%s4168_s0 + $0x6c0] ss:$4 sm:$0xff]   ;;  %v1876_v30 = vld [vmem:[%s4168_s0 + $0x6c3] ss:$4 sm:$0xff]  }
  0x2e   :  { %482 = vrot.lane.b32.xlu1 %v1832_v50, %s2171_s10  ;;  %v1759_v21 = vld [vmem:[%s4168_s0 + $0x640] ss:$4 sm:$0xff]   ;;  %1768 = vst.msk [vmem:[%s4169_s1 + $0x1b0] sm:$0xff] %vm3_vm0, %v1767_v20   ;;  %v1874_v31 = vld [vmem:[%s4168_s0 + $0x643] ss:$4 sm:$0xff]  }
  0x2f   :  { %475 = vrot.lane.b32.xlu0 %v1830_v51, %s2171_s10  ;;  %1760 = vst.msk [vmem:[%s4169_s1 + $0x190] sm:$0xff] %vm3_vm0, %v1759_v21   ;;  %v1783_v24 = vld [vmem:[%s4168_s0 + $0x7c0] ss:$4 sm:$0xff]   ;;  %v1880_v34 = vld [vmem:[%s4168_s0 + $0x7c3] ss:$4 sm:$0xff]  }
  0x30   :  { %v1775_v25 = vld [vmem:[%s4168_s0 + $0x740] ss:$4 sm:$0xff]   ;;  %1784 = vst.msk [vmem:[%s4169_s1 + $0x1f0] sm:$0xff] %vm3_vm0, %v1783_v24   ;;  %v1878_v35 = vld [vmem:[%s4168_s0 + $0x743] ss:$4 sm:$0xff]  }
  0x31   :  { %1776 = vst.msk [vmem:[%s4169_s1 + $0x1d0] sm:$0xff] %vm3_vm0, %v1775_v25   ;;  %v1673_v28 = vld [vmem:[%s4168_s0 + $0xe0] ss:$4 sm:$0xff]   ;;  %v1884_v38 = vld [vmem:[%s4168_s0 + $0xe3] ss:$4 sm:$0xff]  }
  0x32   :  { %496 = vrot.lane.b32.xlu1 %v1836_v54, %s2171_s10  ;;  %v1665_v29 = vld [vmem:[%s4168_s0 + $0x60] ss:$4 sm:$0xff]   ;;  %1674 = vst.msk [vmem:[%s4169_s1 + $0x38] sm:$0xff] %vm3_vm0, %v1673_v28   ;;  %v1882_v39 = vld [vmem:[%s4168_s0 + $0x63] ss:$4 sm:$0xff]  }
  0x33   :  { %489 = vrot.lane.b32.xlu0 %v1834_v55, %s2171_s10  ;;  %1666 = vst.msk [vmem:[%s4169_s1 + $0x18] sm:$0xff] %vm3_vm0, %v1665_v29   ;;  %v1689_v32 = vld [vmem:[%s4168_s0 + $0x1e0] ss:$4 sm:$0xff]   ;;  %v1888_v42 = vld [vmem:[%s4168_s0 + $0x1e3] ss:$4 sm:$0xff]  }
  0x34   :  { %v1681_v33 = vld [vmem:[%s4168_s0 + $0x160] ss:$4 sm:$0xff]   ;;  %1690 = vst.msk [vmem:[%s4169_s1 + $0x78] sm:$0xff] %vm3_vm0, %v1689_v32   ;;  %v1886_v43 = vld [vmem:[%s4168_s0 + $0x163] ss:$4 sm:$0xff]  }
  0x35   :  { %1682 = vst.msk [vmem:[%s4169_s1 + $0x58] sm:$0xff] %vm3_vm0, %v1681_v33   ;;  %v1705_v36 = vld [vmem:[%s4168_s0 + $0x2e0] ss:$4 sm:$0xff]   ;;  %v1892_v46 = vld [vmem:[%s4168_s0 + $0x2e3] ss:$4 sm:$0xff]  }
  0x36   :  { %510 = vrot.lane.b32.xlu1 %v1840_v58, %s2171_s10  ;;  %v1697_v37 = vld [vmem:[%s4168_s0 + $0x260] ss:$4 sm:$0xff]   ;;  %1706 = vst.msk [vmem:[%s4169_s1 + $0xb8] sm:$0xff] %vm3_vm0, %v1705_v36   ;;  %v1890_v47 = vld [vmem:[%s4168_s0 + $0x263] ss:$4 sm:$0xff]  }
  0x37   :  { %503 = vrot.lane.b32.xlu0 %v1838_v59, %s2171_s10  ;;  %1698 = vst.msk [vmem:[%s4169_s1 + $0x98] sm:$0xff] %vm3_vm0, %v1697_v37   ;;  %v1721_v40 = vld [vmem:[%s4168_s0 + $0x3e0] ss:$4 sm:$0xff]   ;;  %v1896_v50 = vld [vmem:[%s4168_s0 + $0x3e3] ss:$4 sm:$0xff]  }
  0x38   :  { %v1713_v41 = vld [vmem:[%s4168_s0 + $0x360] ss:$4 sm:$0xff]   ;;  %1722 = vst.msk [vmem:[%s4169_s1 + $0xf8] sm:$0xff] %vm3_vm0, %v1721_v40   ;;  %v1894_v51 = vld [vmem:[%s4168_s0 + $0x363] ss:$4 sm:$0xff]  }
  0x39   :  { %1714 = vst.msk [vmem:[%s4169_s1 + $0xd8] sm:$0xff] %vm3_vm0, %v1713_v41   ;;  %v1737_v44 = vld [vmem:[%s4168_s0 + $0x4e0] ss:$4 sm:$0xff]   ;;  %v1900_v54 = vld [vmem:[%s4168_s0 + $0x4e3] ss:$4 sm:$0xff]  }
  0x3a   :  { %524 = vrot.lane.b32.xlu1 %v1844_v62, %s2171_s10  ;;  %v1729_v45 = vld [vmem:[%s4168_s0 + $0x460] ss:$4 sm:$0xff]   ;;  %1738 = vst.msk [vmem:[%s4169_s1 + $0x138] sm:$0xff] %vm3_vm0, %v1737_v44   ;;  %v1898_v55 = vld [vmem:[%s4168_s0 + $0x463] ss:$4 sm:$0xff]  }
  0x3b   :  { %517 = vrot.lane.b32.xlu0 %v1842_v63, %s2171_s10  ;;  %1730 = vst.msk [vmem:[%s4169_s1 + $0x118] sm:$0xff] %vm3_vm0, %v1729_v45   ;;  %v1753_v48 = vld [vmem:[%s4168_s0 + $0x5e0] ss:$4 sm:$0xff]   ;;  %v1904_v58 = vld [vmem:[%s4168_s0 + $0x5e3] ss:$4 sm:$0xff]  }
  0x3c   :  { %v1745_v49 = vld [vmem:[%s4168_s0 + $0x560] ss:$4 sm:$0xff]   ;;  %1754 = vst.msk [vmem:[%s4169_s1 + $0x178] sm:$0xff] %vm3_vm0, %v1753_v48   ;;  %v1902_v59 = vld [vmem:[%s4168_s0 + $0x563] ss:$4 sm:$0xff]  }
  0x3d   :  { %1746 = vst.msk [vmem:[%s4169_s1 + $0x158] sm:$0xff] %vm3_vm0, %v1745_v49   ;;  %v1769_v52 = vld [vmem:[%s4168_s0 + $0x6e0] ss:$4 sm:$0xff]   ;;  %v1908_v62 = vld [vmem:[%s4168_s0 + $0x6e3] ss:$4 sm:$0xff]  }
  0x3e   :  { %538 = vrot.lane.b32.xlu1 %v1848_v2, %s2171_s10  ;;  %v1761_v53 = vld [vmem:[%s4168_s0 + $0x660] ss:$4 sm:$0xff]   ;;  %1770 = vst.msk [vmem:[%s4169_s1 + $0x1b8] sm:$0xff] %vm3_vm0, %v1769_v52   ;;  %v1906_v63 = vld [vmem:[%s4168_s0 + $0x663] ss:$4 sm:$0xff]  }
  0x3f   :  { %531 = vrot.lane.b32.xlu0 %v1846_v3, %s2171_s10  ;;  %1762 = vst.msk [vmem:[%s4169_s1 + $0x198] sm:$0xff] %vm3_vm0, %v1761_v53   ;;  %v1785_v56 = vld [vmem:[%s4168_s0 + $0x7e0] ss:$4 sm:$0xff]   ;;  %v1912_v2 = vld [vmem:[%s4168_s0 + $0x7e3] ss:$4 sm:$0xff]  }
  0x40   :  { %v1777_v57 = vld [vmem:[%s4168_s0 + $0x760] ss:$4 sm:$0xff]   ;;  %1786 = vst.msk [vmem:[%s4169_s1 + $0x1f8] sm:$0xff] %vm3_vm0, %v1785_v56   ;;  %v1910_v3 = vld [vmem:[%s4168_s0 + $0x763] ss:$4 sm:$0xff]  }
  0x41   :  { %1778 = vst.msk [vmem:[%s4169_s1 + $0x1d8] sm:$0xff] %vm3_vm0, %v1777_v57  }
  0x42   :  { %552 = vrot.lane.b32.xlu1 %v1852_v6, %s2171_s10  ;;  %v1915_v6 = vld [vmem:[%s4168_s0 + $0x82] ss:$4 sm:$0xff]  }
  0x43   :  { %545 = vrot.lane.b32.xlu0 %v1850_v7, %s2171_s10  ;;  %v1914_v7 = vld [vmem:[%s4168_s0 + $0x2] ss:$4 sm:$0xff]  }
  0x46   :  { %566 = vrot.lane.b32.xlu1 %v1856_v10, %s2171_s10  ;;  %v1919_v10 = vld [vmem:[%s4168_s0 + $0x182] ss:$4 sm:$0xff]  }
  0x47   :  { %559 = vrot.lane.b32.xlu0 %v1854_v11, %s2171_s10  ;;  %v1917_v11 = vld [vmem:[%s4168_s0 + $0x102] ss:$4 sm:$0xff]  }
  0x4a   :  { %580 = vrot.lane.b32.xlu1 %v1860_v14, %s2171_s10  ;;  %v1923_v14 = vld [vmem:[%s4168_s0 + $0x282] ss:$4 sm:$0xff]  }
  0x4b   :  { %573 = vrot.lane.b32.xlu0 %v1858_v15, %s2171_s10  ;;  %v1921_v15 = vld [vmem:[%s4168_s0 + $0x202] ss:$4 sm:$0xff]  }
  0x4e   :  { %594 = vrot.lane.b32.xlu1 %v1864_v18, %s2171_s10  ;;  %v1927_v18 = vld [vmem:[%s4168_s0 + $0x382] ss:$4 sm:$0xff]  }
  0x4f   :  { %587 = vrot.lane.b32.xlu0 %v1862_v19, %s2171_s10  ;;  %v1925_v19 = vld [vmem:[%s4168_s0 + $0x302] ss:$4 sm:$0xff]  }
  0x52   :  { %608 = vrot.lane.b32.xlu1 %v1868_v22, %s2171_s10  ;;  %v1931_v22 = vld [vmem:[%s4168_s0 + $0x482] ss:$4 sm:$0xff]  }
  0x53   :  { %601 = vrot.lane.b32.xlu0 %v1866_v23, %s2171_s10  ;;  %v1929_v23 = vld [vmem:[%s4168_s0 + $0x402] ss:$4 sm:$0xff]  }
  0x56   :  { %622 = vrot.lane.b32.xlu1 %v1872_v26, %s2171_s10  ;;  %v1935_v26 = vld [vmem:[%s4168_s0 + $0x582] ss:$4 sm:$0xff]  }
  0x57   :  { %615 = vrot.lane.b32.xlu0 %v1870_v27, %s2171_s10  ;;  %v1933_v27 = vld [vmem:[%s4168_s0 + $0x502] ss:$4 sm:$0xff]  }
  0x5a   :  { %636 = vrot.lane.b32.xlu1 %v1876_v30, %s2171_s10  ;;  %v1939_v30 = vld [vmem:[%s4168_s0 + $0x682] ss:$4 sm:$0xff]  }
  0x5b   :  { %629 = vrot.lane.b32.xlu0 %v1874_v31, %s2171_s10  ;;  %v1937_v31 = vld [vmem:[%s4168_s0 + $0x602] ss:$4 sm:$0xff]  }
  0x5e   :  { %650 = vrot.lane.b32.xlu1 %v1880_v34, %s2171_s10  ;;  %v1943_v34 = vld [vmem:[%s4168_s0 + $0x782] ss:$4 sm:$0xff]  }
  0x5f   :  { %643 = vrot.lane.b32.xlu0 %v1878_v35, %s2171_s10  ;;  %v1941_v35 = vld [vmem:[%s4168_s0 + $0x702] ss:$4 sm:$0xff]  }
  0x62   :  { %664 = vrot.lane.b32.xlu1 %v1884_v38, %s2171_s10  ;;  %v1947_v38 = vld [vmem:[%s4168_s0 + $0xa2] ss:$4 sm:$0xff]  }
  0x63   :  { %657 = vrot.lane.b32.xlu0 %v1882_v39, %s2171_s10  ;;  %v1945_v39 = vld [vmem:[%s4168_s0 + $0x22] ss:$4 sm:$0xff]  }
  0x66   :  { %678 = vrot.lane.b32.xlu1 %v1888_v42, %s2171_s10  ;;  %v1951_v42 = vld [vmem:[%s4168_s0 + $0x1a2] ss:$4 sm:$0xff]  }
  0x67   :  { %671 = vrot.lane.b32.xlu0 %v1886_v43, %s2171_s10  ;;  %v1949_v43 = vld [vmem:[%s4168_s0 + $0x122] ss:$4 sm:$0xff]  }
  0x6a   :  { %692 = vrot.lane.b32.xlu1 %v1892_v46, %s2171_s10  ;;  %v1955_v46 = vld [vmem:[%s4168_s0 + $0x2a2] ss:$4 sm:$0xff]  }
  0x6b   :  { %685 = vrot.lane.b32.xlu0 %v1890_v47, %s2171_s10  ;;  %v1953_v47 = vld [vmem:[%s4168_s0 + $0x222] ss:$4 sm:$0xff]  }
  0x6e   :  { %706 = vrot.lane.b32.xlu1 %v1896_v50, %s2171_s10  ;;  %v1959_v50 = vld [vmem:[%s4168_s0 + $0x3a2] ss:$4 sm:$0xff]  }
  0x6f   :  { %699 = vrot.lane.b32.xlu0 %v1894_v51, %s2171_s10  ;;  %v1957_v51 = vld [vmem:[%s4168_s0 + $0x322] ss:$4 sm:$0xff]  }
  0x72   :  { %720 = vrot.lane.b32.xlu1 %v1900_v54, %s2171_s10  ;;  %v1963_v54 = vld [vmem:[%s4168_s0 + $0x4a2] ss:$4 sm:$0xff]  }
  0x73   :  { %713 = vrot.lane.b32.xlu0 %v1898_v55, %s2171_s10  ;;  %v1961_v55 = vld [vmem:[%s4168_s0 + $0x422] ss:$4 sm:$0xff]  }
  0x74   :  { %v336_v60 = vpop.permute.xlu1 %335  }
  0x75   :  { %v323_v61 = vpop.permute.xlu0 %322   ;;  %1791 = vst.msk [vmem:[%s4169_s1 + $0x40] sm:$0xff] %vm324_vm1, %v336_v60  }
  0x76   :  { %325 = vst.msk [vmem:[%s4169_s1] sm:$0xff] %vm324_vm1, %v323_v61   ;;  %734 = vrot.lane.b32.xlu1 %v1904_v58, %s2171_s10  ;;  %v1967_v58 = vld [vmem:[%s4168_s0 + $0x5a2] ss:$4 sm:$0xff]  }
  0x77   :  { %727 = vrot.lane.b32.xlu0 %v1902_v59, %s2171_s10  ;;  %v1965_v59 = vld [vmem:[%s4168_s0 + $0x522] ss:$4 sm:$0xff]  }
  0x78   :  { %v343_v0 = vpop.permute.xlu1 %342  }
  0x79   :  { %v329_v1 = vpop.permute.xlu0 %328   ;;  %1793 = vst.msk [vmem:[%s4169_s1 + $0x60] sm:$0xff] %vm324_vm1, %v343_v0  }
  0x7a   :  { %1789 = vst.msk [vmem:[%s4169_s1 + $0x20] sm:$0xff] %vm324_vm1, %v329_v1   ;;  %748 = vrot.lane.b32.xlu1 %v1908_v62, %s2171_s10  ;;  %v1971_v62 = vld [vmem:[%s4168_s0 + $0x6a2] ss:$4 sm:$0xff]  }
  0x7b   :  { %741 = vrot.lane.b32.xlu0 %v1906_v63, %s2171_s10  ;;  %v1969_v63 = vld [vmem:[%s4168_s0 + $0x622] ss:$4 sm:$0xff]  }
  0x7c   :  { %v357_v4 = vpop.permute.xlu1 %356  }
  0x7d   :  { %v350_v5 = vpop.permute.xlu0 %349   ;;  %1797 = vst.msk [vmem:[%s4169_s1 + $0xa0] sm:$0xff] %vm324_vm1, %v357_v4  }
  0x7e   :  { %1795 = vst.msk [vmem:[%s4169_s1 + $0x80] sm:$0xff] %vm324_vm1, %v350_v5   ;;  %762 = vrot.lane.b32.xlu1 %v1912_v2, %s2171_s10  ;;  %v1975_v2 = vld [vmem:[%s4168_s0 + $0x7a2] ss:$4 sm:$0xff]  }
  0x7f   :  { %755 = vrot.lane.b32.xlu0 %v1910_v3, %s2171_s10  ;;  %v1973_v3 = vld [vmem:[%s4168_s0 + $0x722] ss:$4 sm:$0xff]  }
  0x80   :  { %v371_v8 = vpop.permute.xlu1 %370  }
  0x81   :  { %v364_v9 = vpop.permute.xlu0 %363   ;;  %1801 = vst.msk [vmem:[%s4169_s1 + $0xe0] sm:$0xff] %vm324_vm1, %v371_v8  }
  0x82   :  { %1799 = vst.msk [vmem:[%s4169_s1 + $0xc0] sm:$0xff] %vm324_vm1, %v364_v9   ;;  %775 = vrot.lane.b32.xlu1 %v1915_v6, %s2172_s18  ;;  %v1979_v6 = vld [vmem:[%s4168_s0 + $0xc2] ss:$4 sm:$0xff]  }
  0x83   :  { %769 = vrot.lane.b32.xlu0 %v1914_v7, %s2172_s18  ;;  %v1977_v7 = vld [vmem:[%s4168_s0 + $0x42] ss:$4 sm:$0xff]  }
  0x84   :  { %v385_v12 = vpop.permute.xlu1 %384  }
  0x85   :  { %v378_v13 = vpop.permute.xlu0 %377   ;;  %1805 = vst.msk [vmem:[%s4169_s1 + $0x120] sm:$0xff] %vm324_vm1, %v385_v12  }
  0x86   :  { %1803 = vst.msk [vmem:[%s4169_s1 + $0x100] sm:$0xff] %vm324_vm1, %v378_v13   ;;  %789 = vrot.lane.b32.xlu1 %v1919_v10, %s2172_s18  ;;  %v1983_v10 = vld [vmem:[%s4168_s0 + $0x1c2] ss:$4 sm:$0xff]  }
  0x87   :  { %782 = vrot.lane.b32.xlu0 %v1917_v11, %s2172_s18  ;;  %v1981_v11 = vld [vmem:[%s4168_s0 + $0x142] ss:$4 sm:$0xff]  }
  0x88   :  { %v399_v16 = vpop.permute.xlu1 %398  }
  0x89   :  { %v392_v17 = vpop.permute.xlu0 %391   ;;  %1809 = vst.msk [vmem:[%s4169_s1 + $0x160] sm:$0xff] %vm324_vm1, %v399_v16  }
  0x8a   :  { %1807 = vst.msk [vmem:[%s4169_s1 + $0x140] sm:$0xff] %vm324_vm1, %v392_v17   ;;  %803 = vrot.lane.b32.xlu1 %v1923_v14, %s2172_s18  ;;  %v1987_v14 = vld [vmem:[%s4168_s0 + $0x2c2] ss:$4 sm:$0xff]  }
  0x8b   :  { %796 = vrot.lane.b32.xlu0 %v1921_v15, %s2172_s18  ;;  %v1985_v15 = vld [vmem:[%s4168_s0 + $0x242] ss:$4 sm:$0xff]  }
  0x8c   :  { %v413_v20 = vpop.permute.xlu1 %412  }
  0x8d   :  { %v406_v21 = vpop.permute.xlu0 %405   ;;  %1813 = vst.msk [vmem:[%s4169_s1 + $0x1a0] sm:$0xff] %vm324_vm1, %v413_v20  }
  0x8e   :  { %1811 = vst.msk [vmem:[%s4169_s1 + $0x180] sm:$0xff] %vm324_vm1, %v406_v21   ;;  %817 = vrot.lane.b32.xlu1 %v1927_v18, %s2172_s18  ;;  %v1991_v18 = vld [vmem:[%s4168_s0 + $0x3c2] ss:$4 sm:$0xff]  }
  0x8f   :  { %810 = vrot.lane.b32.xlu0 %v1925_v19, %s2172_s18  ;;  %v1989_v19 = vld [vmem:[%s4168_s0 + $0x342] ss:$4 sm:$0xff]  }
  0x90   :  { %v427_v24 = vpop.permute.xlu1 %426  }
  0x91   :  { %v420_v25 = vpop.permute.xlu0 %419   ;;  %1817 = vst.msk [vmem:[%s4169_s1 + $0x1e0] sm:$0xff] %vm324_vm1, %v427_v24  }
  0x92   :  { %1815 = vst.msk [vmem:[%s4169_s1 + $0x1c0] sm:$0xff] %vm324_vm1, %v420_v25   ;;  %831 = vrot.lane.b32.xlu1 %v1931_v22, %s2172_s18  ;;  %v1995_v22 = vld [vmem:[%s4168_s0 + $0x4c2] ss:$4 sm:$0xff]  }
  0x93   :  { %824 = vrot.lane.b32.xlu0 %v1929_v23, %s2172_s18  ;;  %v1993_v23 = vld [vmem:[%s4168_s0 + $0x442] ss:$4 sm:$0xff]  }
  0x94   :  { %v441_v28 = vpop.permute.xlu1 %440  }
  0x95   :  { %v434_v29 = vpop.permute.xlu0 %433   ;;  %1821 = vst.msk [vmem:[%s4169_s1 + $0x28] sm:$0xff] %vm324_vm1, %v441_v28  }
  0x96   :  { %1819 = vst.msk [vmem:[%s4169_s1 + $0x8] sm:$0xff] %vm324_vm1, %v434_v29   ;;  %845 = vrot.lane.b32.xlu1 %v1935_v26, %s2172_s18  ;;  %v1999_v26 = vld [vmem:[%s4168_s0 + $0x5c2] ss:$4 sm:$0xff]  }
  0x97   :  { %838 = vrot.lane.b32.xlu0 %v1933_v27, %s2172_s18  ;;  %v1997_v27 = vld [vmem:[%s4168_s0 + $0x542] ss:$4 sm:$0xff]  }
  0x98   :  { %v455_v32 = vpop.permute.xlu1 %454  }
  0x99   :  { %v448_v33 = vpop.permute.xlu0 %447   ;;  %1825 = vst.msk [vmem:[%s4169_s1 + $0x68] sm:$0xff] %vm324_vm1, %v455_v32  }
  0x9a   :  { %1823 = vst.msk [vmem:[%s4169_s1 + $0x48] sm:$0xff] %vm324_vm1, %v448_v33   ;;  %859 = vrot.lane.b32.xlu1 %v1939_v30, %s2172_s18  ;;  %v2003_v30 = vld [vmem:[%s4168_s0 + $0x6c2] ss:$4 sm:$0xff]  }
  0x9b   :  { %852 = vrot.lane.b32.xlu0 %v1937_v31, %s2172_s18  ;;  %v2001_v31 = vld [vmem:[%s4168_s0 + $0x642] ss:$4 sm:$0xff]  }
  0x9c   :  { %v469_v36 = vpop.permute.xlu1 %468  }
  0x9d   :  { %v462_v37 = vpop.permute.xlu0 %461   ;;  %1829 = vst.msk [vmem:[%s4169_s1 + $0xa8] sm:$0xff] %vm324_vm1, %v469_v36  }
  0x9e   :  { %1827 = vst.msk [vmem:[%s4169_s1 + $0x88] sm:$0xff] %vm324_vm1, %v462_v37   ;;  %873 = vrot.lane.b32.xlu1 %v1943_v34, %s2172_s18  ;;  %v2007_v34 = vld [vmem:[%s4168_s0 + $0x7c2] ss:$4 sm:$0xff]  }
  0x9f   :  { %866 = vrot.lane.b32.xlu0 %v1941_v35, %s2172_s18  ;;  %v2005_v35 = vld [vmem:[%s4168_s0 + $0x742] ss:$4 sm:$0xff]  }
  0xa0   :  { %v483_v40 = vpop.permute.xlu1 %482  }
  0xa1   :  { %v476_v41 = vpop.permute.xlu0 %475   ;;  %1833 = vst.msk [vmem:[%s4169_s1 + $0xe8] sm:$0xff] %vm324_vm1, %v483_v40  }
  0xa2   :  { %1831 = vst.msk [vmem:[%s4169_s1 + $0xc8] sm:$0xff] %vm324_vm1, %v476_v41   ;;  %887 = vrot.lane.b32.xlu1 %v1947_v38, %s2172_s18  ;;  %v2011_v38 = vld [vmem:[%s4168_s0 + $0xe2] ss:$4 sm:$0xff]  }
  0xa3   :  { %880 = vrot.lane.b32.xlu0 %v1945_v39, %s2172_s18  ;;  %v2009_v39 = vld [vmem:[%s4168_s0 + $0x62] ss:$4 sm:$0xff]  }
  0xa4   :  { %v497_v44 = vpop.permute.xlu1 %496  }
  0xa5   :  { %v490_v45 = vpop.permute.xlu0 %489   ;;  %1837 = vst.msk [vmem:[%s4169_s1 + $0x128] sm:$0xff] %vm324_vm1, %v497_v44  }
  0xa6   :  { %1835 = vst.msk [vmem:[%s4169_s1 + $0x108] sm:$0xff] %vm324_vm1, %v490_v45   ;;  %901 = vrot.lane.b32.xlu1 %v1951_v42, %s2172_s18  ;;  %v2015_v42 = vld [vmem:[%s4168_s0 + $0x1e2] ss:$4 sm:$0xff]  }
  0xa7   :  { %894 = vrot.lane.b32.xlu0 %v1949_v43, %s2172_s18  ;;  %v2013_v43 = vld [vmem:[%s4168_s0 + $0x162] ss:$4 sm:$0xff]  }
  0xa8   :  { %v511_v48 = vpop.permute.xlu1 %510  }
  0xa9   :  { %v504_v49 = vpop.permute.xlu0 %503   ;;  %1841 = vst.msk [vmem:[%s4169_s1 + $0x168] sm:$0xff] %vm324_vm1, %v511_v48  }
  0xaa   :  { %1839 = vst.msk [vmem:[%s4169_s1 + $0x148] sm:$0xff] %vm324_vm1, %v504_v49   ;;  %915 = vrot.lane.b32.xlu1 %v1955_v46, %s2172_s18  ;;  %v2019_v46 = vld [vmem:[%s4168_s0 + $0x2e2] ss:$4 sm:$0xff]  }
  0xab   :  { %908 = vrot.lane.b32.xlu0 %v1953_v47, %s2172_s18  ;;  %v2017_v47 = vld [vmem:[%s4168_s0 + $0x262] ss:$4 sm:$0xff]  }
  0xac   :  { %v525_v52 = vpop.permute.xlu1 %524  }
  0xad   :  { %v518_v53 = vpop.permute.xlu0 %517   ;;  %1845 = vst.msk [vmem:[%s4169_s1 + $0x1a8] sm:$0xff] %vm324_vm1, %v525_v52  }
  0xae   :  { %1843 = vst.msk [vmem:[%s4169_s1 + $0x188] sm:$0xff] %vm324_vm1, %v518_v53   ;;  %929 = vrot.lane.b32.xlu1 %v1959_v50, %s2172_s18  ;;  %v2023_v50 = vld [vmem:[%s4168_s0 + $0x3e2] ss:$4 sm:$0xff]  }
  0xaf   :  { %922 = vrot.lane.b32.xlu0 %v1957_v51, %s2172_s18  ;;  %v2021_v51 = vld [vmem:[%s4168_s0 + $0x362] ss:$4 sm:$0xff]  }
  0xb0   :  { %v539_v56 = vpop.permute.xlu1 %538  }
  0xb1   :  { %v532_v57 = vpop.permute.xlu0 %531   ;;  %1849 = vst.msk [vmem:[%s4169_s1 + $0x1e8] sm:$0xff] %vm324_vm1, %v539_v56  }
  0xb2   :  { %1847 = vst.msk [vmem:[%s4169_s1 + $0x1c8] sm:$0xff] %vm324_vm1, %v532_v57   ;;  %943 = vrot.lane.b32.xlu1 %v1963_v54, %s2172_s18  ;;  %v2027_v54 = vld [vmem:[%s4168_s0 + $0x4e2] ss:$4 sm:$0xff]  }
  0xb3   :  { %936 = vrot.lane.b32.xlu0 %v1961_v55, %s2172_s18  ;;  %v2025_v55 = vld [vmem:[%s4168_s0 + $0x462] ss:$4 sm:$0xff]  }
  0xb4   :  { %v553_v60 = vpop.permute.xlu1 %552  }
  0xb5   :  { %v546_v61 = vpop.permute.xlu0 %545   ;;  %1853 = vst.msk [vmem:[%s4169_s1 + $0x30] sm:$0xff] %vm324_vm1, %v553_v60  }
  0xb6   :  { %1851 = vst.msk [vmem:[%s4169_s1 + $0x10] sm:$0xff] %vm324_vm1, %v546_v61   ;;  %957 = vrot.lane.b32.xlu1 %v1967_v58, %s2172_s18  ;;  %v2031_v58 = vld [vmem:[%s4168_s0 + $0x5e2] ss:$4 sm:$0xff]  }
  0xb7   :  { %950 = vrot.lane.b32.xlu0 %v1965_v59, %s2172_s18  ;;  %v2029_v59 = vld [vmem:[%s4168_s0 + $0x562] ss:$4 sm:$0xff]  }
  0xb8   :  { %v567_v0 = vpop.permute.xlu1 %566  }
  0xb9   :  { %v560_v1 = vpop.permute.xlu0 %559   ;;  %1857 = vst.msk [vmem:[%s4169_s1 + $0x70] sm:$0xff] %vm324_vm1, %v567_v0  }
  0xba   :  { %1855 = vst.msk [vmem:[%s4169_s1 + $0x50] sm:$0xff] %vm324_vm1, %v560_v1   ;;  %971 = vrot.lane.b32.xlu1 %v1971_v62, %s2172_s18  ;;  %v2035_v62 = vld [vmem:[%s4168_s0 + $0x6e2] ss:$4 sm:$0xff]  }
  0xbb   :  { %964 = vrot.lane.b32.xlu0 %v1969_v63, %s2172_s18  ;;  %v2033_v63 = vld [vmem:[%s4168_s0 + $0x662] ss:$4 sm:$0xff]  }
  0xbc   :  { %v581_v4 = vpop.permute.xlu1 %580  }
  0xbd   :  { %v574_v5 = vpop.permute.xlu0 %573   ;;  %1861 = vst.msk [vmem:[%s4169_s1 + $0xb0] sm:$0xff] %vm324_vm1, %v581_v4  }
  0xbe   :  { %1859 = vst.msk [vmem:[%s4169_s1 + $0x90] sm:$0xff] %vm324_vm1, %v574_v5   ;;  %985 = vrot.lane.b32.xlu1 %v1975_v2, %s2172_s18  ;;  %v2039_v2 = vld [vmem:[%s4168_s0 + $0x7e2] ss:$4 sm:$0xff]  }
  0xbf   :  { %978 = vrot.lane.b32.xlu0 %v1973_v3, %s2172_s18  ;;  %v2037_v3 = vld [vmem:[%s4168_s0 + $0x762] ss:$4 sm:$0xff]  }
  0xc0   :  { %v595_v8 = vpop.permute.xlu1 %594  }
  0xc1   :  { %v588_v9 = vpop.permute.xlu0 %587   ;;  %1865 = vst.msk [vmem:[%s4169_s1 + $0xf0] sm:$0xff] %vm324_vm1, %v595_v8  }
  0xc2   :  { %1863 = vst.msk [vmem:[%s4169_s1 + $0xd0] sm:$0xff] %vm324_vm1, %v588_v9   ;;  %999 = vrot.lane.b32.xlu1 %v1979_v6, %s2172_s18  ;;  %v2042_v6 = vld [vmem:[%s4168_s0 + $0x81] ss:$4 sm:$0xff]  }
  0xc3   :  { %992 = vrot.lane.b32.xlu0 %v1977_v7, %s2172_s18  ;;  %v2041_v7 = vld [vmem:[%s4168_s0 + $0x1] ss:$4 sm:$0xff]  }
  0xc4   :  { %v609_v12 = vpop.permute.xlu1 %608  }
  0xc5   :  { %v602_v13 = vpop.permute.xlu0 %601   ;;  %1869 = vst.msk [vmem:[%s4169_s1 + $0x130] sm:$0xff] %vm324_vm1, %v609_v12  }
  0xc6   :  { %1867 = vst.msk [vmem:[%s4169_s1 + $0x110] sm:$0xff] %vm324_vm1, %v602_v13   ;;  %1013 = vrot.lane.b32.xlu1 %v1983_v10, %s2172_s18  ;;  %v2046_v10 = vld [vmem:[%s4168_s0 + $0x181] ss:$4 sm:$0xff]  }
  0xc7   :  { %1006 = vrot.lane.b32.xlu0 %v1981_v11, %s2172_s18  ;;  %v2044_v11 = vld [vmem:[%s4168_s0 + $0x101] ss:$4 sm:$0xff]  }
  0xc8   :  { %v623_v16 = vpop.permute.xlu1 %622  }
  0xc9   :  { %v616_v17 = vpop.permute.xlu0 %615   ;;  %1873 = vst.msk [vmem:[%s4169_s1 + $0x170] sm:$0xff] %vm324_vm1, %v623_v16  }
  0xca   :  { %1871 = vst.msk [vmem:[%s4169_s1 + $0x150] sm:$0xff] %vm324_vm1, %v616_v17   ;;  %1027 = vrot.lane.b32.xlu1 %v1987_v14, %s2172_s18  ;;  %v2050_v14 = vld [vmem:[%s4168_s0 + $0x281] ss:$4 sm:$0xff]  }
  0xcb   :  { %1020 = vrot.lane.b32.xlu0 %v1985_v15, %s2172_s18  ;;  %v2048_v15 = vld [vmem:[%s4168_s0 + $0x201] ss:$4 sm:$0xff]  }
  0xcc   :  { %v637_v20 = vpop.permute.xlu1 %636  }
  0xcd   :  { %v630_v21 = vpop.permute.xlu0 %629   ;;  %1877 = vst.msk [vmem:[%s4169_s1 + $0x1b0] sm:$0xff] %vm324_vm1, %v637_v20  }
  0xce   :  { %1875 = vst.msk [vmem:[%s4169_s1 + $0x190] sm:$0xff] %vm324_vm1, %v630_v21   ;;  %1041 = vrot.lane.b32.xlu1 %v1991_v18, %s2172_s18  ;;  %v2054_v18 = vld [vmem:[%s4168_s0 + $0x381] ss:$4 sm:$0xff]  }
  0xcf   :  { %1034 = vrot.lane.b32.xlu0 %v1989_v19, %s2172_s18  ;;  %v2052_v19 = vld [vmem:[%s4168_s0 + $0x301] ss:$4 sm:$0xff]  }
  0xd0   :  { %v651_v24 = vpop.permute.xlu1 %650  }
  0xd1   :  { %v644_v25 = vpop.permute.xlu0 %643   ;;  %1881 = vst.msk [vmem:[%s4169_s1 + $0x1f0] sm:$0xff] %vm324_vm1, %v651_v24  }
  0xd2   :  { %1879 = vst.msk [vmem:[%s4169_s1 + $0x1d0] sm:$0xff] %vm324_vm1, %v644_v25   ;;  %1055 = vrot.lane.b32.xlu1 %v1995_v22, %s2172_s18  ;;  %v2058_v22 = vld [vmem:[%s4168_s0 + $0x481] ss:$4 sm:$0xff]  }
  0xd3   :  { %1048 = vrot.lane.b32.xlu0 %v1993_v23, %s2172_s18  ;;  %v2056_v23 = vld [vmem:[%s4168_s0 + $0x401] ss:$4 sm:$0xff]  }
  0xd4   :  { %v665_v28 = vpop.permute.xlu1 %664  }
  0xd5   :  { %v658_v29 = vpop.permute.xlu0 %657   ;;  %1885 = vst.msk [vmem:[%s4169_s1 + $0x38] sm:$0xff] %vm324_vm1, %v665_v28  }
  0xd6   :  { %1883 = vst.msk [vmem:[%s4169_s1 + $0x18] sm:$0xff] %vm324_vm1, %v658_v29   ;;  %1069 = vrot.lane.b32.xlu1 %v1999_v26, %s2172_s18  ;;  %v2062_v26 = vld [vmem:[%s4168_s0 + $0x581] ss:$4 sm:$0xff]  }
  0xd7   :  { %1062 = vrot.lane.b32.xlu0 %v1997_v27, %s2172_s18  ;;  %v2060_v27 = vld [vmem:[%s4168_s0 + $0x501] ss:$4 sm:$0xff]  }
  0xd8   :  { %v679_v32 = vpop.permute.xlu1 %678  }
  0xd9   :  { %v672_v33 = vpop.permute.xlu0 %671   ;;  %1889 = vst.msk [vmem:[%s4169_s1 + $0x78] sm:$0xff] %vm324_vm1, %v679_v32  }
  0xda   :  { %1887 = vst.msk [vmem:[%s4169_s1 + $0x58] sm:$0xff] %vm324_vm1, %v672_v33   ;;  %1083 = vrot.lane.b32.xlu1 %v2003_v30, %s2172_s18  ;;  %v2066_v30 = vld [vmem:[%s4168_s0 + $0x681] ss:$4 sm:$0xff]  }
  0xdb   :  { %1076 = vrot.lane.b32.xlu0 %v2001_v31, %s2172_s18  ;;  %v2064_v31 = vld [vmem:[%s4168_s0 + $0x601] ss:$4 sm:$0xff]  }
  0xdc   :  { %v693_v36 = vpop.permute.xlu1 %692  }
  0xdd   :  { %v686_v37 = vpop.permute.xlu0 %685   ;;  %1893 = vst.msk [vmem:[%s4169_s1 + $0xb8] sm:$0xff] %vm324_vm1, %v693_v36  }
  0xde   :  { %1891 = vst.msk [vmem:[%s4169_s1 + $0x98] sm:$0xff] %vm324_vm1, %v686_v37   ;;  %1097 = vrot.lane.b32.xlu1 %v2007_v34, %s2172_s18  ;;  %v2070_v34 = vld [vmem:[%s4168_s0 + $0x781] ss:$4 sm:$0xff]  }
  0xdf   :  { %1090 = vrot.lane.b32.xlu0 %v2005_v35, %s2172_s18  ;;  %v2068_v35 = vld [vmem:[%s4168_s0 + $0x701] ss:$4 sm:$0xff]  }
  0xe0   :  { %v707_v40 = vpop.permute.xlu1 %706  }
  0xe1   :  { %v700_v41 = vpop.permute.xlu0 %699   ;;  %1897 = vst.msk [vmem:[%s4169_s1 + $0xf8] sm:$0xff] %vm324_vm1, %v707_v40  }
  0xe2   :  { %1895 = vst.msk [vmem:[%s4169_s1 + $0xd8] sm:$0xff] %vm324_vm1, %v700_v41   ;;  %1111 = vrot.lane.b32.xlu1 %v2011_v38, %s2172_s18  ;;  %v2074_v38 = vld [vmem:[%s4168_s0 + $0xa1] ss:$4 sm:$0xff]  }
  0xe3   :  { %1104 = vrot.lane.b32.xlu0 %v2009_v39, %s2172_s18  ;;  %v2072_v39 = vld [vmem:[%s4168_s0 + $0x21] ss:$4 sm:$0xff]  }
  0xe4   :  { %v721_v44 = vpop.permute.xlu1 %720  }
  0xe5   :  { %v714_v45 = vpop.permute.xlu0 %713   ;;  %1901 = vst.msk [vmem:[%s4169_s1 + $0x138] sm:$0xff] %vm324_vm1, %v721_v44  }
  0xe6   :  { %1899 = vst.msk [vmem:[%s4169_s1 + $0x118] sm:$0xff] %vm324_vm1, %v714_v45   ;;  %1125 = vrot.lane.b32.xlu1 %v2015_v42, %s2172_s18  ;;  %v2078_v42 = vld [vmem:[%s4168_s0 + $0x1a1] ss:$4 sm:$0xff]  }
  0xe7   :  { %1118 = vrot.lane.b32.xlu0 %v2013_v43, %s2172_s18  ;;  %v2076_v43 = vld [vmem:[%s4168_s0 + $0x121] ss:$4 sm:$0xff]  }
  0xe8   :  { %v735_v48 = vpop.permute.xlu1 %734  }
  0xe9   :  { %v728_v49 = vpop.permute.xlu0 %727   ;;  %1905 = vst.msk [vmem:[%s4169_s1 + $0x178] sm:$0xff] %vm324_vm1, %v735_v48  }
  0xea   :  { %1903 = vst.msk [vmem:[%s4169_s1 + $0x158] sm:$0xff] %vm324_vm1, %v728_v49   ;;  %1139 = vrot.lane.b32.xlu1 %v2019_v46, %s2172_s18  ;;  %v2082_v46 = vld [vmem:[%s4168_s0 + $0x2a1] ss:$4 sm:$0xff]  }
  0xeb   :  { %1132 = vrot.lane.b32.xlu0 %v2017_v47, %s2172_s18  ;;  %v2080_v47 = vld [vmem:[%s4168_s0 + $0x221] ss:$4 sm:$0xff]  }
  0xec   :  { %v749_v52 = vpop.permute.xlu1 %748  }
  0xed   :  { %v742_v53 = vpop.permute.xlu0 %741   ;;  %1909 = vst.msk [vmem:[%s4169_s1 + $0x1b8] sm:$0xff] %vm324_vm1, %v749_v52  }
  0xee   :  { %1907 = vst.msk [vmem:[%s4169_s1 + $0x198] sm:$0xff] %vm324_vm1, %v742_v53   ;;  %1153 = vrot.lane.b32.xlu1 %v2023_v50, %s2172_s18  ;;  %v2086_v50 = vld [vmem:[%s4168_s0 + $0x3a1] ss:$4 sm:$0xff]  }
  0xef   :  { %1146 = vrot.lane.b32.xlu0 %v2021_v51, %s2172_s18  ;;  %v2084_v51 = vld [vmem:[%s4168_s0 + $0x321] ss:$4 sm:$0xff]  }
  0xf0   :  { %v763_v56 = vpop.permute.xlu1 %762  }
  0xf1   :  { %v756_v57 = vpop.permute.xlu0 %755   ;;  %1913 = vst.msk [vmem:[%s4169_s1 + $0x1f8] sm:$0xff] %vm324_vm1, %v763_v56  }
  0xf2   :  { %1911 = vst.msk [vmem:[%s4169_s1 + $0x1d8] sm:$0xff] %vm324_vm1, %v756_v57   ;;  %1167 = vrot.lane.b32.xlu1 %v2027_v54, %s2172_s18  ;;  %v2090_v54 = vld [vmem:[%s4168_s0 + $0x4a1] ss:$4 sm:$0xff]  }
  0xf3   :  { %1160 = vrot.lane.b32.xlu0 %v2025_v55, %s2172_s18  ;;  %v2088_v55 = vld [vmem:[%s4168_s0 + $0x421] ss:$4 sm:$0xff]  }
  0xf4   :  { %v776_v60 = vpop.permute.xlu1 %775  }
  0xf5   :  { %v770_v61 = vpop.permute.xlu0 %769   ;;  %1916 = vst.msk [vmem:[%s4169_s1 + $0x20] sm:$0xff] %vm771_vm2, %v776_v60  }
  0xf6   :  { %772 = vst.msk [vmem:[%s4169_s1] sm:$0xff] %vm771_vm2, %v770_v61   ;;  %1181 = vrot.lane.b32.xlu1 %v2031_v58, %s2172_s18  ;;  %v2094_v58 = vld [vmem:[%s4168_s0 + $0x5a1] ss:$4 sm:$0xff]  }
  0xf7   :  { %1174 = vrot.lane.b32.xlu0 %v2029_v59, %s2172_s18  ;;  %v2092_v59 = vld [vmem:[%s4168_s0 + $0x521] ss:$4 sm:$0xff]  }
  0xf8   :  { %v790_v0 = vpop.permute.xlu1 %789  }
  0xf9   :  { %v783_v1 = vpop.permute.xlu0 %782   ;;  %1920 = vst.msk [vmem:[%s4169_s1 + $0x60] sm:$0xff] %vm771_vm2, %v790_v0  }
  0xfa   :  { %1918 = vst.msk [vmem:[%s4169_s1 + $0x40] sm:$0xff] %vm771_vm2, %v783_v1   ;;  %1195 = vrot.lane.b32.xlu1 %v2035_v62, %s2172_s18  ;;  %v2098_v62 = vld [vmem:[%s4168_s0 + $0x6a1] ss:$4 sm:$0xff]  }
  0xfb   :  { %1188 = vrot.lane.b32.xlu0 %v2033_v63, %s2172_s18  ;;  %v2096_v63 = vld [vmem:[%s4168_s0 + $0x621] ss:$4 sm:$0xff]  }
  0xfc   :  { %v804_v4 = vpop.permute.xlu1 %803  }
  0xfd   :  { %v797_v5 = vpop.permute.xlu0 %796   ;;  %1924 = vst.msk [vmem:[%s4169_s1 + $0xa0] sm:$0xff] %vm771_vm2, %v804_v4  }
  0xfe   :  { %1922 = vst.msk [vmem:[%s4169_s1 + $0x80] sm:$0xff] %vm771_vm2, %v797_v5   ;;  %1209 = vrot.lane.b32.xlu1 %v2039_v2, %s2172_s18  ;;  %v2102_v2 = vld [vmem:[%s4168_s0 + $0x7a1] ss:$4 sm:$0xff]  }
  0xff   :  { %1202 = vrot.lane.b32.xlu0 %v2037_v3, %s2172_s18  ;;  %v2100_v3 = vld [vmem:[%s4168_s0 + $0x721] ss:$4 sm:$0xff]  }
 0x100   :  { %v818_v8 = vpop.permute.xlu1 %817  }
 0x101   :  { %v811_v9 = vpop.permute.xlu0 %810   ;;  %1928 = vst.msk [vmem:[%s4169_s1 + $0xe0] sm:$0xff] %vm771_vm2, %v818_v8  }
 0x102   :  { %1926 = vst.msk [vmem:[%s4169_s1 + $0xc0] sm:$0xff] %vm771_vm2, %v811_v9   ;;  %1222 = vrot.lane.b32.xlu1 %v2042_v6, %s2173_s22  ;;  %v2106_v6 = vld [vmem:[%s4168_s0 + $0xc1] ss:$4 sm:$0xff]  }
 0x103   :  { %1216 = vrot.lane.b32.xlu0 %v2041_v7, %s2173_s22  ;;  %v2104_v7 = vld [vmem:[%s4168_s0 + $0x41] ss:$4 sm:$0xff]  }
 0x104   :  { %v832_v12 = vpop.permute.xlu1 %831  }
 0x105   :  { %v825_v13 = vpop.permute.xlu0 %824   ;;  %1932 = vst.msk [vmem:[%s4169_s1 + $0x120] sm:$0xff] %vm771_vm2, %v832_v12  }
 0x106   :  { %1930 = vst.msk [vmem:[%s4169_s1 + $0x100] sm:$0xff] %vm771_vm2, %v825_v13   ;;  %1236 = vrot.lane.b32.xlu1 %v2046_v10, %s2173_s22  ;;  %v2110_v10 = vld [vmem:[%s4168_s0 + $0x1c1] ss:$4 sm:$0xff]  }
 0x107   :  { %1229 = vrot.lane.b32.xlu0 %v2044_v11, %s2173_s22  ;;  %v2108_v11 = vld [vmem:[%s4168_s0 + $0x141] ss:$4 sm:$0xff]  }
 0x108   :  { %v846_v16 = vpop.permute.xlu1 %845  }
 0x109   :  { %v839_v17 = vpop.permute.xlu0 %838   ;;  %1936 = vst.msk [vmem:[%s4169_s1 + $0x160] sm:$0xff] %vm771_vm2, %v846_v16  }
 0x10a   :  { %1934 = vst.msk [vmem:[%s4169_s1 + $0x140] sm:$0xff] %vm771_vm2, %v839_v17   ;;  %1250 = vrot.lane.b32.xlu1 %v2050_v14, %s2173_s22  ;;  %v2114_v14 = vld [vmem:[%s4168_s0 + $0x2c1] ss:$4 sm:$0xff]  }
 0x10b   :  { %1243 = vrot.lane.b32.xlu0 %v2048_v15, %s2173_s22  ;;  %v2112_v15 = vld [vmem:[%s4168_s0 + $0x241] ss:$4 sm:$0xff]  }
 0x10c   :  { %v860_v20 = vpop.permute.xlu1 %859  }
 0x10d   :  { %v853_v21 = vpop.permute.xlu0 %852   ;;  %1940 = vst.msk [vmem:[%s4169_s1 + $0x1a0] sm:$0xff] %vm771_vm2, %v860_v20  }
 0x10e   :  { %1938 = vst.msk [vmem:[%s4169_s1 + $0x180] sm:$0xff] %vm771_vm2, %v853_v21   ;;  %1264 = vrot.lane.b32.xlu1 %v2054_v18, %s2173_s22  ;;  %v2118_v18 = vld [vmem:[%s4168_s0 + $0x3c1] ss:$4 sm:$0xff]  }
 0x10f   :  { %1257 = vrot.lane.b32.xlu0 %v2052_v19, %s2173_s22  ;;  %v2116_v19 = vld [vmem:[%s4168_s0 + $0x341] ss:$4 sm:$0xff]  }
 0x110   :  { %v874_v24 = vpop.permute.xlu1 %873  }
 0x111   :  { %v867_v25 = vpop.permute.xlu0 %866   ;;  %1944 = vst.msk [vmem:[%s4169_s1 + $0x1e0] sm:$0xff] %vm771_vm2, %v874_v24  }
 0x112   :  { %1942 = vst.msk [vmem:[%s4169_s1 + $0x1c0] sm:$0xff] %vm771_vm2, %v867_v25   ;;  %1278 = vrot.lane.b32.xlu1 %v2058_v22, %s2173_s22  ;;  %v2122_v22 = vld [vmem:[%s4168_s0 + $0x4c1] ss:$4 sm:$0xff]  }
 0x113   :  { %1271 = vrot.lane.b32.xlu0 %v2056_v23, %s2173_s22  ;;  %v2120_v23 = vld [vmem:[%s4168_s0 + $0x441] ss:$4 sm:$0xff]  }
 0x114   :  { %v888_v28 = vpop.permute.xlu1 %887  }
 0x115   :  { %v881_v29 = vpop.permute.xlu0 %880   ;;  %1948 = vst.msk [vmem:[%s4169_s1 + $0x28] sm:$0xff] %vm771_vm2, %v888_v28  }
 0x116   :  { %1946 = vst.msk [vmem:[%s4169_s1 + $0x8] sm:$0xff] %vm771_vm2, %v881_v29   ;;  %1292 = vrot.lane.b32.xlu1 %v2062_v26, %s2173_s22  ;;  %v2126_v26 = vld [vmem:[%s4168_s0 + $0x5c1] ss:$4 sm:$0xff]  }
 0x117   :  { %1285 = vrot.lane.b32.xlu0 %v2060_v27, %s2173_s22  ;;  %v2124_v27 = vld [vmem:[%s4168_s0 + $0x541] ss:$4 sm:$0xff]  }
 0x118   :  { %v902_v32 = vpop.permute.xlu1 %901  }
 0x119   :  { %v895_v33 = vpop.permute.xlu0 %894   ;;  %1952 = vst.msk [vmem:[%s4169_s1 + $0x68] sm:$0xff] %vm771_vm2, %v902_v32  }
 0x11a   :  { %1950 = vst.msk [vmem:[%s4169_s1 + $0x48] sm:$0xff] %vm771_vm2, %v895_v33   ;;  %1306 = vrot.lane.b32.xlu1 %v2066_v30, %s2173_s22  ;;  %v2130_v30 = vld [vmem:[%s4168_s0 + $0x6c1] ss:$4 sm:$0xff]  }
 0x11b   :  { %1299 = vrot.lane.b32.xlu0 %v2064_v31, %s2173_s22  ;;  %v2128_v31 = vld [vmem:[%s4168_s0 + $0x641] ss:$4 sm:$0xff]  }
 0x11c   :  { %v916_v36 = vpop.permute.xlu1 %915  }
 0x11d   :  { %v909_v37 = vpop.permute.xlu0 %908   ;;  %1956 = vst.msk [vmem:[%s4169_s1 + $0xa8] sm:$0xff] %vm771_vm2, %v916_v36  }
 0x11e   :  { %1954 = vst.msk [vmem:[%s4169_s1 + $0x88] sm:$0xff] %vm771_vm2, %v909_v37   ;;  %1320 = vrot.lane.b32.xlu1 %v2070_v34, %s2173_s22  ;;  %v2134_v34 = vld [vmem:[%s4168_s0 + $0x7c1] ss:$4 sm:$0xff]  }
 0x11f   :  { %1313 = vrot.lane.b32.xlu0 %v2068_v35, %s2173_s22  ;;  %v2132_v35 = vld [vmem:[%s4168_s0 + $0x741] ss:$4 sm:$0xff]  }
 0x120   :  { %v930_v40 = vpop.permute.xlu1 %929  }
 0x121   :  { %v923_v41 = vpop.permute.xlu0 %922   ;;  %1960 = vst.msk [vmem:[%s4169_s1 + $0xe8] sm:$0xff] %vm771_vm2, %v930_v40  }
 0x122   :  { %1958 = vst.msk [vmem:[%s4169_s1 + $0xc8] sm:$0xff] %vm771_vm2, %v923_v41   ;;  %1334 = vrot.lane.b32.xlu1 %v2074_v38, %s2173_s22  ;;  %v2138_v38 = vld [vmem:[%s4168_s0 + $0xe1] ss:$4 sm:$0xff]  }
 0x123   :  { %1327 = vrot.lane.b32.xlu0 %v2072_v39, %s2173_s22  ;;  %v2136_v39 = vld [vmem:[%s4168_s0 + $0x61] ss:$4 sm:$0xff]  }
 0x124   :  { %v944_v44 = vpop.permute.xlu1 %943  }
 0x125   :  { %v937_v45 = vpop.permute.xlu0 %936   ;;  %1964 = vst.msk [vmem:[%s4169_s1 + $0x128] sm:$0xff] %vm771_vm2, %v944_v44  }
 0x126   :  { %1962 = vst.msk [vmem:[%s4169_s1 + $0x108] sm:$0xff] %vm771_vm2, %v937_v45   ;;  %1348 = vrot.lane.b32.xlu1 %v2078_v42, %s2173_s22  ;;  %v2142_v42 = vld [vmem:[%s4168_s0 + $0x1e1] ss:$4 sm:$0xff]  }
 0x127   :  { %1341 = vrot.lane.b32.xlu0 %v2076_v43, %s2173_s22  ;;  %v2140_v43 = vld [vmem:[%s4168_s0 + $0x161] ss:$4 sm:$0xff]  }
 0x128   :  { %v958_v48 = vpop.permute.xlu1 %957  }
 0x129   :  { %v951_v49 = vpop.permute.xlu0 %950   ;;  %1968 = vst.msk [vmem:[%s4169_s1 + $0x168] sm:$0xff] %vm771_vm2, %v958_v48  }
 0x12a   :  { %1966 = vst.msk [vmem:[%s4169_s1 + $0x148] sm:$0xff] %vm771_vm2, %v951_v49   ;;  %1362 = vrot.lane.b32.xlu1 %v2082_v46, %s2173_s22  ;;  %v2146_v46 = vld [vmem:[%s4168_s0 + $0x2e1] ss:$4 sm:$0xff]  }
 0x12b   :  { %1355 = vrot.lane.b32.xlu0 %v2080_v47, %s2173_s22  ;;  %v2144_v47 = vld [vmem:[%s4168_s0 + $0x261] ss:$4 sm:$0xff]  }
 0x12c   :  { %v972_v52 = vpop.permute.xlu1 %971  }
 0x12d   :  { %v965_v53 = vpop.permute.xlu0 %964   ;;  %1972 = vst.msk [vmem:[%s4169_s1 + $0x1a8] sm:$0xff] %vm771_vm2, %v972_v52  }
 0x12e   :  { %1970 = vst.msk [vmem:[%s4169_s1 + $0x188] sm:$0xff] %vm771_vm2, %v965_v53   ;;  %1376 = vrot.lane.b32.xlu1 %v2086_v50, %s2173_s22  ;;  %v2150_v50 = vld [vmem:[%s4168_s0 + $0x3e1] ss:$4 sm:$0xff]  }
 0x12f   :  { %1369 = vrot.lane.b32.xlu0 %v2084_v51, %s2173_s22  ;;  %v2148_v51 = vld [vmem:[%s4168_s0 + $0x361] ss:$4 sm:$0xff]  }
 0x130   :  { %v986_v56 = vpop.permute.xlu1 %985  }
 0x131   :  { %v979_v57 = vpop.permute.xlu0 %978   ;;  %1976 = vst.msk [vmem:[%s4169_s1 + $0x1e8] sm:$0xff] %vm771_vm2, %v986_v56  }
 0x132   :  { %1974 = vst.msk [vmem:[%s4169_s1 + $0x1c8] sm:$0xff] %vm771_vm2, %v979_v57   ;;  %1390 = vrot.lane.b32.xlu1 %v2090_v54, %s2173_s22  ;;  %v2154_v54 = vld [vmem:[%s4168_s0 + $0x4e1] ss:$4 sm:$0xff]  }
 0x133   :  { %1383 = vrot.lane.b32.xlu0 %v2088_v55, %s2173_s22  ;;  %v2152_v55 = vld [vmem:[%s4168_s0 + $0x461] ss:$4 sm:$0xff]  }
 0x134   :  { %v1000_v60 = vpop.permute.xlu1 %999  }
 0x135   :  { %v993_v61 = vpop.permute.xlu0 %992   ;;  %1980 = vst.msk [vmem:[%s4169_s1 + $0x30] sm:$0xff] %vm771_vm2, %v1000_v60  }
 0x136   :  { %1978 = vst.msk [vmem:[%s4169_s1 + $0x10] sm:$0xff] %vm771_vm2, %v993_v61   ;;  %1404 = vrot.lane.b32.xlu1 %v2094_v58, %s2173_s22  ;;  %v2158_v58 = vld [vmem:[%s4168_s0 + $0x5e1] ss:$4 sm:$0xff]  }
 0x137   :  { %1397 = vrot.lane.b32.xlu0 %v2092_v59, %s2173_s22  ;;  %v2156_v59 = vld [vmem:[%s4168_s0 + $0x561] ss:$4 sm:$0xff]  }
 0x138   :  { %v1014_v0 = vpop.permute.xlu1 %1013  }
 0x139   :  { %v1007_v1 = vpop.permute.xlu0 %1006   ;;  %1984 = vst.msk [vmem:[%s4169_s1 + $0x70] sm:$0xff] %vm771_vm2, %v1014_v0  }
 0x13a   :  { %1982 = vst.msk [vmem:[%s4169_s1 + $0x50] sm:$0xff] %vm771_vm2, %v1007_v1   ;;  %1418 = vrot.lane.b32.xlu1 %v2098_v62, %s2173_s22  ;;  %v2162_v62 = vld [vmem:[%s4168_s0 + $0x6e1] ss:$4 sm:$0xff]  }
 0x13b   :  { %1411 = vrot.lane.b32.xlu0 %v2096_v63, %s2173_s22  ;;  %v2160_v63 = vld [vmem:[%s4168_s0 + $0x661] ss:$4 sm:$0xff]  }
 0x13c   :  { %v1028_v4 = vpop.permute.xlu1 %1027  }
 0x13d   :  { %v1021_v5 = vpop.permute.xlu0 %1020   ;;  %1988 = vst.msk [vmem:[%s4169_s1 + $0xb0] sm:$0xff] %vm771_vm2, %v1028_v4  }
 0x13e   :  { %1986 = vst.msk [vmem:[%s4169_s1 + $0x90] sm:$0xff] %vm771_vm2, %v1021_v5   ;;  %1432 = vrot.lane.b32.xlu1 %v2102_v2, %s2173_s22  ;;  %v2166_v2 = vld [vmem:[%s4168_s0 + $0x7e1] ss:$4 sm:$0xff]  }
 0x13f   :  { %1425 = vrot.lane.b32.xlu0 %v2100_v3, %s2173_s22  ;;  %v2164_v3 = vld [vmem:[%s4168_s0 + $0x761] ss:$4 sm:$0xff]  }
 0x140   :  { %v1042_v8 = vpop.permute.xlu1 %1041  }
 0x141   :  { %v1035_v9 = vpop.permute.xlu0 %1034   ;;  %1992 = vst.msk [vmem:[%s4169_s1 + $0xf0] sm:$0xff] %vm771_vm2, %v1042_v8  }
 0x142   :  { %1990 = vst.msk [vmem:[%s4169_s1 + $0xd0] sm:$0xff] %vm771_vm2, %v1035_v9   ;;  %1446 = vrot.lane.b32.xlu1 %v2106_v6, %s2173_s22 }
 0x143   :  { %1439 = vrot.lane.b32.xlu0 %v2104_v7, %s2173_s22 }
 0x144   :  { %v1056_v12 = vpop.permute.xlu1 %1055  }
 0x145   :  { %v1049_v13 = vpop.permute.xlu0 %1048   ;;  %1996 = vst.msk [vmem:[%s4169_s1 + $0x130] sm:$0xff] %vm771_vm2, %v1056_v12  }
 0x146   :  { %1994 = vst.msk [vmem:[%s4169_s1 + $0x110] sm:$0xff] %vm771_vm2, %v1049_v13   ;;  %1460 = vrot.lane.b32.xlu1 %v2110_v10, %s2173_s22 }
 0x147   :  { %1453 = vrot.lane.b32.xlu0 %v2108_v11, %s2173_s22 }
 0x148   :  { %v1070_v16 = vpop.permute.xlu1 %1069  }
 0x149   :  { %v1063_v17 = vpop.permute.xlu0 %1062   ;;  %2000 = vst.msk [vmem:[%s4169_s1 + $0x170] sm:$0xff] %vm771_vm2, %v1070_v16  }
 0x14a   :  { %1998 = vst.msk [vmem:[%s4169_s1 + $0x150] sm:$0xff] %vm771_vm2, %v1063_v17   ;;  %1474 = vrot.lane.b32.xlu1 %v2114_v14, %s2173_s22 }
 0x14b   :  { %1467 = vrot.lane.b32.xlu0 %v2112_v15, %s2173_s22 }
 0x14c   :  { %v1084_v20 = vpop.permute.xlu1 %1083  }
 0x14d   :  { %v1077_v21 = vpop.permute.xlu0 %1076   ;;  %2004 = vst.msk [vmem:[%s4169_s1 + $0x1b0] sm:$0xff] %vm771_vm2, %v1084_v20  }
 0x14e   :  { %2002 = vst.msk [vmem:[%s4169_s1 + $0x190] sm:$0xff] %vm771_vm2, %v1077_v21   ;;  %1488 = vrot.lane.b32.xlu1 %v2118_v18, %s2173_s22 }
 0x14f   :  { %1481 = vrot.lane.b32.xlu0 %v2116_v19, %s2173_s22 }
 0x150   :  { %v1098_v24 = vpop.permute.xlu1 %1097  }
 0x151   :  { %v1091_v25 = vpop.permute.xlu0 %1090   ;;  %2008 = vst.msk [vmem:[%s4169_s1 + $0x1f0] sm:$0xff] %vm771_vm2, %v1098_v24  }
 0x152   :  { %2006 = vst.msk [vmem:[%s4169_s1 + $0x1d0] sm:$0xff] %vm771_vm2, %v1091_v25   ;;  %1502 = vrot.lane.b32.xlu1 %v2122_v22, %s2173_s22 }
 0x153   :  { %1495 = vrot.lane.b32.xlu0 %v2120_v23, %s2173_s22 }
 0x154   :  { %v1112_v28 = vpop.permute.xlu1 %1111  }
 0x155   :  { %v1105_v29 = vpop.permute.xlu0 %1104   ;;  %2012 = vst.msk [vmem:[%s4169_s1 + $0x38] sm:$0xff] %vm771_vm2, %v1112_v28  }
 0x156   :  { %2010 = vst.msk [vmem:[%s4169_s1 + $0x18] sm:$0xff] %vm771_vm2, %v1105_v29   ;;  %1516 = vrot.lane.b32.xlu1 %v2126_v26, %s2173_s22 }
 0x157   :  { %1509 = vrot.lane.b32.xlu0 %v2124_v27, %s2173_s22 }
 0x158   :  { %v1126_v32 = vpop.permute.xlu1 %1125  }
 0x159   :  { %v1119_v33 = vpop.permute.xlu0 %1118   ;;  %2016 = vst.msk [vmem:[%s4169_s1 + $0x78] sm:$0xff] %vm771_vm2, %v1126_v32  }
 0x15a   :  { %2014 = vst.msk [vmem:[%s4169_s1 + $0x58] sm:$0xff] %vm771_vm2, %v1119_v33   ;;  %1530 = vrot.lane.b32.xlu1 %v2130_v30, %s2173_s22 }
 0x15b   :  { %1523 = vrot.lane.b32.xlu0 %v2128_v31, %s2173_s22 }
 0x15c   :  { %v1140_v36 = vpop.permute.xlu1 %1139  }
 0x15d   :  { %v1133_v37 = vpop.permute.xlu0 %1132   ;;  %2020 = vst.msk [vmem:[%s4169_s1 + $0xb8] sm:$0xff] %vm771_vm2, %v1140_v36  }
 0x15e   :  { %2018 = vst.msk [vmem:[%s4169_s1 + $0x98] sm:$0xff] %vm771_vm2, %v1133_v37   ;;  %1544 = vrot.lane.b32.xlu1 %v2134_v34, %s2173_s22 }
 0x15f   :  { %1537 = vrot.lane.b32.xlu0 %v2132_v35, %s2173_s22 }
 0x160   :  { %v1154_v40 = vpop.permute.xlu1 %1153  }
 0x161   :  { %v1147_v41 = vpop.permute.xlu0 %1146   ;;  %2024 = vst.msk [vmem:[%s4169_s1 + $0xf8] sm:$0xff] %vm771_vm2, %v1154_v40  }
 0x162   :  { %2022 = vst.msk [vmem:[%s4169_s1 + $0xd8] sm:$0xff] %vm771_vm2, %v1147_v41   ;;  %1558 = vrot.lane.b32.xlu1 %v2138_v38, %s2173_s22 }
 0x163   :  { %1551 = vrot.lane.b32.xlu0 %v2136_v39, %s2173_s22 }
 0x164   :  { %v1168_v44 = vpop.permute.xlu1 %1167  }
 0x165   :  { %v1161_v45 = vpop.permute.xlu0 %1160   ;;  %2028 = vst.msk [vmem:[%s4169_s1 + $0x138] sm:$0xff] %vm771_vm2, %v1168_v44  }
 0x166   :  { %2026 = vst.msk [vmem:[%s4169_s1 + $0x118] sm:$0xff] %vm771_vm2, %v1161_v45   ;;  %1572 = vrot.lane.b32.xlu1 %v2142_v42, %s2173_s22 }
 0x167   :  { %1565 = vrot.lane.b32.xlu0 %v2140_v43, %s2173_s22 }
 0x168   :  { %v1182_v48 = vpop.permute.xlu1 %1181  }
 0x169   :  { %v1175_v49 = vpop.permute.xlu0 %1174   ;;  %2032 = vst.msk [vmem:[%s4169_s1 + $0x178] sm:$0xff] %vm771_vm2, %v1182_v48  }
 0x16a   :  { %2030 = vst.msk [vmem:[%s4169_s1 + $0x158] sm:$0xff] %vm771_vm2, %v1175_v49   ;;  %1586 = vrot.lane.b32.xlu1 %v2146_v46, %s2173_s22 }
 0x16b   :  { %1579 = vrot.lane.b32.xlu0 %v2144_v47, %s2173_s22 }
 0x16c   :  { %v1196_v52 = vpop.permute.xlu1 %1195  }
 0x16d   :  { %v1189_v53 = vpop.permute.xlu0 %1188   ;;  %2036 = vst.msk [vmem:[%s4169_s1 + $0x1b8] sm:$0xff] %vm771_vm2, %v1196_v52  }
 0x16e   :  { %2034 = vst.msk [vmem:[%s4169_s1 + $0x198] sm:$0xff] %vm771_vm2, %v1189_v53   ;;  %1600 = vrot.lane.b32.xlu1 %v2150_v50, %s2173_s22 }
 0x16f   :  { %1593 = vrot.lane.b32.xlu0 %v2148_v51, %s2173_s22 }
 0x170   :  { %v1210_v56 = vpop.permute.xlu1 %1209  }
 0x171   :  { %v1203_v57 = vpop.permute.xlu0 %1202   ;;  %2040 = vst.msk [vmem:[%s4169_s1 + $0x1f8] sm:$0xff] %vm771_vm2, %v1210_v56  }
 0x172   :  { %2038 = vst.msk [vmem:[%s4169_s1 + $0x1d8] sm:$0xff] %vm771_vm2, %v1203_v57   ;;  %1614 = vrot.lane.b32.xlu1 %v2154_v54, %s2173_s22 }
 0x173   :  { %1607 = vrot.lane.b32.xlu0 %v2152_v55, %s2173_s22 }
 0x174   :  { %v1223_v60 = vpop.permute.xlu1 %1222  }
 0x175   :  { %v1217_v61 = vpop.permute.xlu0 %1216   ;;  %2043 = vst.msk [vmem:[%s4169_s1 + $0x20] sm:$0xff] %vm1218_vm3, %v1223_v60  }
 0x176   :  { %1219 = vst.msk [vmem:[%s4169_s1] sm:$0xff] %vm1218_vm3, %v1217_v61   ;;  %1628 = vrot.lane.b32.xlu1 %v2158_v58, %s2173_s22 }
 0x177   :  { %1621 = vrot.lane.b32.xlu0 %v2156_v59, %s2173_s22 }
 0x178   :  { %v1237_v0 = vpop.permute.xlu1 %1236  }
 0x179   :  { %v1230_v1 = vpop.permute.xlu0 %1229   ;;  %2047 = vst.msk [vmem:[%s4169_s1 + $0x60] sm:$0xff] %vm1218_vm3, %v1237_v0  }
 0x17a   :  { %2045 = vst.msk [vmem:[%s4169_s1 + $0x40] sm:$0xff] %vm1218_vm3, %v1230_v1   ;;  %1642 = vrot.lane.b32.xlu1 %v2162_v62, %s2173_s22 }
 0x17b   :  { %1635 = vrot.lane.b32.xlu0 %v2160_v63, %s2173_s22 }
 0x17c   :  { %v1251_v4 = vpop.permute.xlu1 %1250  }
 0x17d   :  { %v1244_v5 = vpop.permute.xlu0 %1243   ;;  %2051 = vst.msk [vmem:[%s4169_s1 + $0xa0] sm:$0xff] %vm1218_vm3, %v1251_v4  }
 0x17e   :  { %2049 = vst.msk [vmem:[%s4169_s1 + $0x80] sm:$0xff] %vm1218_vm3, %v1244_v5   ;;  %1656 = vrot.lane.b32.xlu1 %v2166_v2, %s2173_s22 }
 0x17f   :  { %1649 = vrot.lane.b32.xlu0 %v2164_v3, %s2173_s22 }
 0x180   :  { %v1265_v6 = vpop.permute.xlu1 %1264  }
 0x181   :  { %v1258_v7 = vpop.permute.xlu0 %1257   ;;  %2055 = vst.msk [vmem:[%s4169_s1 + $0xe0] sm:$0xff] %vm1218_vm3, %v1265_v6  }
 0x182   :  { %2053 = vst.msk [vmem:[%s4169_s1 + $0xc0] sm:$0xff] %vm1218_vm3, %v1258_v7  }
 0x184   :  { %v1279_v8 = vpop.permute.xlu1 %1278  }
 0x185   :  { %v1272_v9 = vpop.permute.xlu0 %1271   ;;  %2059 = vst.msk [vmem:[%s4169_s1 + $0x120] sm:$0xff] %vm1218_vm3, %v1279_v8  }
 0x186   :  { %2057 = vst.msk [vmem:[%s4169_s1 + $0x100] sm:$0xff] %vm1218_vm3, %v1272_v9  }
 0x188   :  { %v1293_v10 = vpop.permute.xlu1 %1292  }
 0x189   :  { %v1286_v11 = vpop.permute.xlu0 %1285   ;;  %2063 = vst.msk [vmem:[%s4169_s1 + $0x160] sm:$0xff] %vm1218_vm3, %v1293_v10  }
 0x18a   :  { %2061 = vst.msk [vmem:[%s4169_s1 + $0x140] sm:$0xff] %vm1218_vm3, %v1286_v11  }
 0x18c   :  { %v1307_v12 = vpop.permute.xlu1 %1306  }
 0x18d   :  { %v1300_v13 = vpop.permute.xlu0 %1299   ;;  %2067 = vst.msk [vmem:[%s4169_s1 + $0x1a0] sm:$0xff] %vm1218_vm3, %v1307_v12  }
 0x18e   :  { %2065 = vst.msk [vmem:[%s4169_s1 + $0x180] sm:$0xff] %vm1218_vm3, %v1300_v13  }
 0x190   :  { %v1321_v14 = vpop.permute.xlu1 %1320  }
 0x191   :  { %v1314_v15 = vpop.permute.xlu0 %1313   ;;  %2071 = vst.msk [vmem:[%s4169_s1 + $0x1e0] sm:$0xff] %vm1218_vm3, %v1321_v14  }
 0x192   :  { %2069 = vst.msk [vmem:[%s4169_s1 + $0x1c0] sm:$0xff] %vm1218_vm3, %v1314_v15  }
 0x194   :  { %v1335_v16 = vpop.permute.xlu1 %1334  }
 0x195   :  { %v1328_v17 = vpop.permute.xlu0 %1327   ;;  %2075 = vst.msk [vmem:[%s4169_s1 + $0x28] sm:$0xff] %vm1218_vm3, %v1335_v16  }
 0x196   :  { %2073 = vst.msk [vmem:[%s4169_s1 + $0x8] sm:$0xff] %vm1218_vm3, %v1328_v17  }
 0x198   :  { %v1349_v18 = vpop.permute.xlu1 %1348  }
 0x199   :  { %v1342_v19 = vpop.permute.xlu0 %1341   ;;  %2079 = vst.msk [vmem:[%s4169_s1 + $0x68] sm:$0xff] %vm1218_vm3, %v1349_v18  }
 0x19a   :  { %2077 = vst.msk [vmem:[%s4169_s1 + $0x48] sm:$0xff] %vm1218_vm3, %v1342_v19  }
 0x19c   :  { %v1363_v20 = vpop.permute.xlu1 %1362  }
 0x19d   :  { %v1356_v21 = vpop.permute.xlu0 %1355   ;;  %2083 = vst.msk [vmem:[%s4169_s1 + $0xa8] sm:$0xff] %vm1218_vm3, %v1363_v20  }
 0x19e   :  { %2081 = vst.msk [vmem:[%s4169_s1 + $0x88] sm:$0xff] %vm1218_vm3, %v1356_v21  }
 0x1a0   :  { %v1377_v22 = vpop.permute.xlu1 %1376  }
 0x1a1   :  { %v1370_v23 = vpop.permute.xlu0 %1369   ;;  %2087 = vst.msk [vmem:[%s4169_s1 + $0xe8] sm:$0xff] %vm1218_vm3, %v1377_v22  }
 0x1a2   :  { %2085 = vst.msk [vmem:[%s4169_s1 + $0xc8] sm:$0xff] %vm1218_vm3, %v1370_v23  }
 0x1a4   :  { %v1391_v24 = vpop.permute.xlu1 %1390  }
 0x1a5   :  { %v1384_v25 = vpop.permute.xlu0 %1383   ;;  %2091 = vst.msk [vmem:[%s4169_s1 + $0x128] sm:$0xff] %vm1218_vm3, %v1391_v24  }
 0x1a6   :  { %2089 = vst.msk [vmem:[%s4169_s1 + $0x108] sm:$0xff] %vm1218_vm3, %v1384_v25  }
 0x1a8   :  { %v1405_v26 = vpop.permute.xlu1 %1404  }
 0x1a9   :  { %v1398_v27 = vpop.permute.xlu0 %1397   ;;  %2095 = vst.msk [vmem:[%s4169_s1 + $0x168] sm:$0xff] %vm1218_vm3, %v1405_v26  }
 0x1aa   :  { %2093 = vst.msk [vmem:[%s4169_s1 + $0x148] sm:$0xff] %vm1218_vm3, %v1398_v27  }
 0x1ac   :  { %v1419_v28 = vpop.permute.xlu1 %1418  }
 0x1ad   :  { %v1412_v29 = vpop.permute.xlu0 %1411   ;;  %2099 = vst.msk [vmem:[%s4169_s1 + $0x1a8] sm:$0xff] %vm1218_vm3, %v1419_v28  }
 0x1ae   :  { %2097 = vst.msk [vmem:[%s4169_s1 + $0x188] sm:$0xff] %vm1218_vm3, %v1412_v29  }
 0x1b0   :  { %v1433_v30 = vpop.permute.xlu1 %1432  }
 0x1b1   :  { %v1426_v31 = vpop.permute.xlu0 %1425   ;;  %2103 = vst.msk [vmem:[%s4169_s1 + $0x1e8] sm:$0xff] %vm1218_vm3, %v1433_v30  }
 0x1b2   :  { %2101 = vst.msk [vmem:[%s4169_s1 + $0x1c8] sm:$0xff] %vm1218_vm3, %v1426_v31  }
 0x1b4   :  { %v1447_v32 = vpop.permute.xlu1 %1446  }
 0x1b5   :  { %v1440_v33 = vpop.permute.xlu0 %1439   ;;  %2107 = vst.msk [vmem:[%s4169_s1 + $0x30] sm:$0xff] %vm1218_vm3, %v1447_v32  }
 0x1b6   :  { %2105 = vst.msk [vmem:[%s4169_s1 + $0x10] sm:$0xff] %vm1218_vm3, %v1440_v33  }
 0x1b8   :  { %v1461_v34 = vpop.permute.xlu1 %1460  }
 0x1b9   :  { %v1454_v35 = vpop.permute.xlu0 %1453   ;;  %2111 = vst.msk [vmem:[%s4169_s1 + $0x70] sm:$0xff] %vm1218_vm3, %v1461_v34  }
 0x1ba   :  { %2109 = vst.msk [vmem:[%s4169_s1 + $0x50] sm:$0xff] %vm1218_vm3, %v1454_v35  }
 0x1bc   :  { %v1475_v36 = vpop.permute.xlu1 %1474  }
 0x1bd   :  { %v1468_v37 = vpop.permute.xlu0 %1467   ;;  %2115 = vst.msk [vmem:[%s4169_s1 + $0xb0] sm:$0xff] %vm1218_vm3, %v1475_v36  }
 0x1be   :  { %2113 = vst.msk [vmem:[%s4169_s1 + $0x90] sm:$0xff] %vm1218_vm3, %v1468_v37  }
 0x1c0   :  { %v1489_v38 = vpop.permute.xlu1 %1488  }
 0x1c1   :  { %v1482_v39 = vpop.permute.xlu0 %1481   ;;  %2119 = vst.msk [vmem:[%s4169_s1 + $0xf0] sm:$0xff] %vm1218_vm3, %v1489_v38  }
 0x1c2   :  { %2117 = vst.msk [vmem:[%s4169_s1 + $0xd0] sm:$0xff] %vm1218_vm3, %v1482_v39  }
 0x1c4   :  { %v1503_v40 = vpop.permute.xlu1 %1502  }
 0x1c5   :  { %v1496_v41 = vpop.permute.xlu0 %1495   ;;  %2123 = vst.msk [vmem:[%s4169_s1 + $0x130] sm:$0xff] %vm1218_vm3, %v1503_v40  }
 0x1c6   :  { %2121 = vst.msk [vmem:[%s4169_s1 + $0x110] sm:$0xff] %vm1218_vm3, %v1496_v41  }
 0x1c8   :  { %v1517_v42 = vpop.permute.xlu1 %1516  }
 0x1c9   :  { %v1510_v43 = vpop.permute.xlu0 %1509   ;;  %2127 = vst.msk [vmem:[%s4169_s1 + $0x170] sm:$0xff] %vm1218_vm3, %v1517_v42  }
 0x1ca   :  { %2125 = vst.msk [vmem:[%s4169_s1 + $0x150] sm:$0xff] %vm1218_vm3, %v1510_v43  }
 0x1cc   :  { %v1531_v44 = vpop.permute.xlu1 %1530  }
 0x1cd   :  { %v1524_v45 = vpop.permute.xlu0 %1523   ;;  %2131 = vst.msk [vmem:[%s4169_s1 + $0x1b0] sm:$0xff] %vm1218_vm3, %v1531_v44  }
 0x1ce   :  { %2129 = vst.msk [vmem:[%s4169_s1 + $0x190] sm:$0xff] %vm1218_vm3, %v1524_v45  }
 0x1d0   :  { %v1545_v46 = vpop.permute.xlu1 %1544  }
 0x1d1   :  { %v1538_v47 = vpop.permute.xlu0 %1537   ;;  %2135 = vst.msk [vmem:[%s4169_s1 + $0x1f0] sm:$0xff] %vm1218_vm3, %v1545_v46  }
 0x1d2   :  { %2133 = vst.msk [vmem:[%s4169_s1 + $0x1d0] sm:$0xff] %vm1218_vm3, %v1538_v47  }
 0x1d4   :  { %v1559_v48 = vpop.permute.xlu1 %1558  }
 0x1d5   :  { %v1552_v49 = vpop.permute.xlu0 %1551   ;;  %2139 = vst.msk [vmem:[%s4169_s1 + $0x38] sm:$0xff] %vm1218_vm3, %v1559_v48  }
 0x1d6   :  { %2137 = vst.msk [vmem:[%s4169_s1 + $0x18] sm:$0xff] %vm1218_vm3, %v1552_v49  }
 0x1d8   :  { %v1573_v50 = vpop.permute.xlu1 %1572  }
 0x1d9   :  { %v1566_v51 = vpop.permute.xlu0 %1565   ;;  %2143 = vst.msk [vmem:[%s4169_s1 + $0x78] sm:$0xff] %vm1218_vm3, %v1573_v50  }
 0x1da   :  { %2141 = vst.msk [vmem:[%s4169_s1 + $0x58] sm:$0xff] %vm1218_vm3, %v1566_v51  }
 0x1dc   :  { %v1587_v52 = vpop.permute.xlu1 %1586  }
 0x1dd   :  { %v1580_v53 = vpop.permute.xlu0 %1579   ;;  %2147 = vst.msk [vmem:[%s4169_s1 + $0xb8] sm:$0xff] %vm1218_vm3, %v1587_v52  }
 0x1de   :  { %2145 = vst.msk [vmem:[%s4169_s1 + $0x98] sm:$0xff] %vm1218_vm3, %v1580_v53  }
 0x1e0   :  { %v1601_v54 = vpop.permute.xlu1 %1600  }
 0x1e1   :  { %v1594_v55 = vpop.permute.xlu0 %1593   ;;  %2151 = vst.msk [vmem:[%s4169_s1 + $0xf8] sm:$0xff] %vm1218_vm3, %v1601_v54  }
 0x1e2   :  { %2149 = vst.msk [vmem:[%s4169_s1 + $0xd8] sm:$0xff] %vm1218_vm3, %v1594_v55  }
 0x1e4   :  { %v1615_v56 = vpop.permute.xlu1 %1614  }
 0x1e5   :  { %v1608_v57 = vpop.permute.xlu0 %1607   ;;  %2155 = vst.msk [vmem:[%s4169_s1 + $0x138] sm:$0xff] %vm1218_vm3, %v1615_v56  }
 0x1e6   :  { %2153 = vst.msk [vmem:[%s4169_s1 + $0x118] sm:$0xff] %vm1218_vm3, %v1608_v57  }
 0x1e8   :  { %v1629_v58 = vpop.permute.xlu1 %1628  }
 0x1e9   :  { %v1622_v59 = vpop.permute.xlu0 %1621   ;;  %2159 = vst.msk [vmem:[%s4169_s1 + $0x178] sm:$0xff] %vm1218_vm3, %v1629_v58  }
 0x1ea   :  { %2157 = vst.msk [vmem:[%s4169_s1 + $0x158] sm:$0xff] %vm1218_vm3, %v1622_v59  }
 0x1ec   :  { %v1643_v60 = vpop.permute.xlu1 %1642  }
 0x1ed   :  { %v1636_v61 = vpop.permute.xlu0 %1635   ;;  %2163 = vst.msk [vmem:[%s4169_s1 + $0x1b8] sm:$0xff] %vm1218_vm3, %v1643_v60  }
 0x1ee   :  { %2161 = vst.msk [vmem:[%s4169_s1 + $0x198] sm:$0xff] %vm1218_vm3, %v1636_v61  }
 0x1f0   :  { %v1657_v62 = vpop.permute.xlu1 %1656  }
 0x1f1   :  { %v1650_v63 = vpop.permute.xlu0 %1649   ;;  %2167 = vst.msk [vmem:[%s4169_s1 + $0x1f8] sm:$0xff] %vm1218_vm3, %v1657_v62  }
 0x1f2   :  { %2165 = vst.msk [vmem:[%s4169_s1 + $0x1d8] sm:$0xff] %vm1218_vm3, %v1650_v63  }

// kernel: binary_sparse_cellnet_forward.1
= control target key start
LH: loop header
LB: loop body
LE: loop exit
PB: predicated region body
PF: predicated region fallthrough
CT: control target
= control target key end

     0   :  { %s1271_s26 = smov 0   ;;  %s1478_s0 = inlined_call_operand.vmem [shape: f32[512,32], index: 0, kind: input, shape index: {}]   ;;  %s1479_s1 = inlined_call_operand.vmem [shape: bf16[32,128], index: 1, kind: input, shape index: {}]   ;;  %s1480_s2 = inlined_call_operand.vmem [shape: f32[1,128], index: 2, kind: input, shape index: {}]   ;;  %s1481_s3 = inlined_call_operand.vmem [shape: bf16[128,128], index: 3, kind: input, shape index: {}]   ;;  %s1482_s4 = inlined_call_operand.vmem [shape: f32[1,128], index: 4, kind: input, shape index: {}]   ;;  %s1483_s5 = inlined_call_operand.vmem [shape: bf16[8,128], index: 5, kind: input, shape index: {}]   ;;  %s1484_s6 = inlined_call_operand.<no memory space> [shape: f32[1], index: 6, kind: input, shape index: {}]   ;;  %s1485_s7 = inlined_call_operand.vmem [shape: f32[2,4,256], index: 7, kind: output, shape index: {}]  }
   0x1   :  { %12 = sst [smem:[#allocation2]] %s1484_s6 }
   0x2 LB: > { %s1277_s27 = sadd.s32 4294967295, %s1226_s26   ;;  %p1012_p0 = scmp.ge.s32.totalorder %s1226_s26, 1  ;;  %s1226_s26 = sphi %s1271_s26, %s18_s26  }
   0x3   : > { %p239_p1 = scmp.lt.s32.totalorder %s1226_s26, 3 }
   0x5   : > { %p240_p2 = pnand %p1012_p0, %p239_p1 }
   0x6   : > { %v1202_v0 = vld [vmem:[%s1479_s1] sm:$0xff] (!%p240_p2)   ;;  %s1013_s6 = sshll.u32 (!%p240_p2), %s1277_s27, 5  ;;  %v1203_v1 = vld [vmem:[%s1479_s1 + $0x8] sm:$0xff] (!%p240_p2)   ;;  %v1206_v4 = vld [vmem:[%s1481_s3 + $0x10] sm:$0xff] (!%p240_p2)   ;;  %vm354_vm0 = vcmask (!%p240_p2), 261120   ;;  %p277_p4 = scmp.lt.s32.totalorder (!%p240_p2), %s1277_s27, 1 }
   0x7   : > { %243 = sbr.rel (%p240_p2) target bundleno = 804 (0x324), region = 48  ;;  %p272_p3 = scmp.lt.s32.totalorder (!%p240_p2), %s1013_s6, 63  ;;  %1110 = vmatprep.subr.bf16.mxu0 (!%p240_p2), %v1202_v0  ;;  %v1204_v2 = vld [vmem:[%s1481_s3] sm:$0xff] (!%p240_p2)   ;;  %v1205_v3 = vld [vmem:[%s1481_s3 + $0x8] sm:$0xff] (!%p240_p2)   ;;  %v1207_v14 = vld [vmem:[%s1481_s3 + $0x18] sm:$0xff] (!%p240_p2)  }
   0x8   : > { %1111 = vmatpush3.bf16.msra.mxu0 (!%p240_p2), %v1202_v0  ;;  %1146 = vmatprep.subr.bf16.mxu1 (!%p240_p2), %v1204_v2  ;;  %v1208_v19 = vld [vmem:[%s1481_s3 + $0x20] sm:$0xff] (!%p240_p2)   ;;  %v1209_v22 = vld [vmem:[%s1481_s3 + $0x28] sm:$0xff] (!%p240_p2)   ;;  %v1210_v56 = vld [vmem:[%s1481_s3 + $0x30] sm:$0xff] (!%p240_p2)  }
   0x9   : > { %1112 = vmatprep.subr.bf16.mxu0 (!%p240_p2), %v1203_v1  ;;  %1147 = vmatpush3.bf16.msra.mxu1 (!%p240_p2), %v1204_v2  ;;  %v1211_v57 = vld [vmem:[%s1481_s3 + $0x38] sm:$0xff] (!%p240_p2)   ;;  %v1368_v58 = vld [vmem:[%s1480_s2] ss:$0 sm:$0xff] (!%p240_p2) }
   0xa   : > { %1148 = vmatprep.subr.bf16.mxu1 (!%p240_p2), %v1205_v3 }
   0xc   : > { %1113 = vmatpush3.bf16.msra.mxu0 (!%p240_p2), %v1203_v1 }
   0xd   : > { %1149 = vmatpush3.bf16.msra.mxu1 (!%p240_p2), %v1205_v3 }
   0xe   : > { %s1487_s6 = smov (!%p272_p3, %s1013_s6), 63  ;;  %1150 = vmatprep.subr.bf16.mxu1 %v1206_v4  ;;  %s1489_s27 = smov (!%p277_p4, %s1277_s27), 1 }
   0xf   : > { %s1014_s13 = sshll.u32 %s1487_s6, 3  ;;  %s1049_s14 = sshll.u32 %s1489_s27, 3 }
  0x10   : > { %s1297_s16 = scalar_lea.vmem %s1478_s0, %s1014_s13  ;;  %s893_s13 = sld [smem:[#allocation2]] }
  0x11   : > { %v283_v5 = vld [vmem:[%s1297_s16] sm:$0xff]  ;;  %v284_v6 = vld [vmem:[%s1297_s16 + $0x8] sm:$0xff]  ;;  %v285_v7 = vld [vmem:[%s1297_s16 + $0x10] sm:$0xff]  ;;  %1151 = vmatpush3.bf16.msra.mxu1 %v1206_v4  ;;  %s281_s17 = scalar_lea.vmem %s1485_s7, %s1049_s14 }
  0x12   : > { %v315_v8 = vpack.c.bf16 %v284_v6, %v283_v5  ;;  %v286_v9 = vld [vmem:[%s1297_s16 + $0x18] sm:$0xff]  ;;  %v287_v10 = vld [vmem:[%s1297_s16 + $0x20] sm:$0xff]  ;;  %v288_v11 = vld [vmem:[%s1297_s16 + $0x28] sm:$0xff]  ;;  %1152 = vmatprep.subr.bf16.mxu1 %v1207_v14 }
  0x13   : > { %v316_v12 = vpack.c.bf16 %v286_v9, %v285_v7  ;;  %v317_v13 = vpack.c.bf16 %v288_v11, %v287_v10  ;;  %v289_v15 = vld [vmem:[%s1297_s16 + $0x30] sm:$0xff]  ;;  %v290_v16 = vld [vmem:[%s1297_s16 + $0x38] sm:$0xff]  ;;  %v291_v17 = vld [vmem:[%s1297_s16 + $0x40] sm:$0xff] }
  0x14   : > { %1114 = vmatprep.mubr.msk.bf16.mxu0 %vm354_vm0, %v315_v8  ;;  %v292_v18 = vld [vmem:[%s1297_s16 + $0x48] sm:$0xff]  ;;  %v318_v20 = vpack.c.bf16 %v290_v16, %v289_v15  ;;  %v293_v23 = vld [vmem:[%s1297_s16 + $0x50] sm:$0xff]  ;;  %v294_v24 = vld [vmem:[%s1297_s16 + $0x58] sm:$0xff] }
  0x15   : > { %1115 = vmatmul.mubr.msk.bf16.vlgmr.msra.gmra.mrb[0].mxu0 %vm354_vm0, %v316_v12  ;;  %v319_v21 = vpack.c.bf16 %v292_v18, %v291_v17  ;;  %1153 = vmatpush3.bf16.msra.mxu1 %v1207_v14  ;;  %v295_v25 = vld [vmem:[%s1297_s16 + $0x60] sm:$0xff]  ;;  %v296_v26 = vld [vmem:[%s1297_s16 + $0x68] sm:$0xff]  ;;  %v320_v27 = vpack.c.bf16 %v294_v24, %v293_v23  ;;  %v297_v29 = vld [vmem:[%s1297_s16 + $0x70] sm:$0xff] }
  0x16   : > { %1118 = vmatprep.mubr.msk.bf16.mxu0 %vm354_vm0, %v317_v13  ;;  %1154 = vmatprep.subr.bf16.mxu1 %v1208_v19  ;;  %v321_v28 = vpack.c.bf16 %v296_v26, %v295_v25  ;;  %v298_v30 = vld [vmem:[%s1297_s16 + $0x78] sm:$0xff]  ;;  %v299_v31 = vld [vmem:[%s1297_s16 + $0x80] sm:$0xff]  ;;  %v300_v32 = vld [vmem:[%s1297_s16 + $0x88] sm:$0xff] }
  0x17   : > { %v322_v33 = vpack.c.bf16 %v298_v30, %v297_v29  ;;  %v323_v34 = vpack.c.bf16 %v300_v32, %v299_v31  ;;  %v301_v35 = vld [vmem:[%s1297_s16 + $0x90] sm:$0xff]  ;;  %v302_v36 = vld [vmem:[%s1297_s16 + $0x98] sm:$0xff]  ;;  %v303_v37 = vld [vmem:[%s1297_s16 + $0xa0] sm:$0xff] }
  0x18   : > { %v304_v38 = vld [vmem:[%s1297_s16 + $0xa8] sm:$0xff]  ;;  %v324_v39 = vpack.c.bf16 %v302_v36, %v301_v35  ;;  %v305_v41 = vld [vmem:[%s1297_s16 + $0xb0] sm:$0xff]  ;;  %v306_v42 = vld [vmem:[%s1297_s16 + $0xb8] sm:$0xff] }
  0x19   : > { %1155 = vmatpush3.bf16.msra.mxu1 %v1208_v19  ;;  %v325_v40 = vpack.c.bf16 %v304_v38, %v303_v37  ;;  %v307_v43 = vld [vmem:[%s1297_s16 + $0xc0] sm:$0xff]  ;;  %v308_v44 = vld [vmem:[%s1297_s16 + $0xc8] sm:$0xff]  ;;  %v326_v45 = vpack.c.bf16 %v306_v42, %v305_v41  ;;  %v309_v47 = vld [vmem:[%s1297_s16 + $0xd0] sm:$0xff] }
  0x1a   : > { %1156 = vmatprep.subr.bf16.mxu1 %v1209_v22  ;;  %v327_v46 = vpack.c.bf16 %v308_v44, %v307_v43  ;;  %v310_v48 = vld [vmem:[%s1297_s16 + $0xd8] sm:$0xff]  ;;  %v311_v49 = vld [vmem:[%s1297_s16 + $0xe0] sm:$0xff]  ;;  %v312_v50 = vld [vmem:[%s1297_s16 + $0xe8] sm:$0xff] }
  0x1b   : > { %v328_v51 = vpack.c.bf16 %v310_v48, %v309_v47  ;;  %v329_v52 = vpack.c.bf16 %v312_v50, %v311_v49  ;;  %v313_v53 = vld [vmem:[%s1297_s16 + $0xf0] sm:$0xff]  ;;  %v314_v54 = vld [vmem:[%s1297_s16 + $0xf8] sm:$0xff] }
  0x1c   : > { %v330_v55 = vpack.c.bf16 %v314_v54, %v313_v53 }
  0x1d   : > { %1119 = vmatmul.mubr.msk.bf16.gmra.mrb[4].mxu0 %vm354_vm0, %v318_v20  ;;  %1157 = vmatpush3.bf16.msra.mxu1 %v1209_v22 }
  0x1e   : > { %1122 = vmatprep.mubr.msk.bf16.mxu0 %vm354_vm0, %v319_v21  ;;  %1158 = vmatprep.subr.bf16.mxu1 %v1210_v56 }
  0x21   : > { %1159 = vmatpush3.bf16.msra.mxu1 %v1210_v56 }
  0x22   : > { %1160 = vmatprep.subr.bf16.mxu1 %v1211_v57 }
  0x25   : > { %1123 = vmatmul.mubr.msk.bf16.gmra.mrb[8].mxu0 %vm354_vm0, %v320_v27  ;;  %1161 = vmatpush3.bf16.msra.mxu1 %v1211_v57 }
  0x26   : > { %1126 = vmatprep.mubr.msk.bf16.mxu0 %vm354_vm0, %v321_v28 }
  0x2d   : > { %1127 = vmatmul.mubr.msk.bf16.gmra.mrb[12].mxu0 %vm354_vm0, %v322_v33 }
  0x2e   : > { %1130 = vmatprep.mubr.msk.bf16.mxu0 %vm354_vm0, %v323_v34 }
  0x35   : > { %1131 = vmatmul.mubr.msk.bf16.gmra.mrb[16].mxu0 %vm354_vm0, %v324_v39 }
  0x36   : > { %1134 = vmatprep.mubr.msk.bf16.mxu0 %vm354_vm0, %v325_v40 }
  0x3d   : > { %1135 = vmatmul.mubr.msk.bf16.gmra.mrb[20].mxu0 %vm354_vm0, %v326_v45 }
  0x3e   : > { %1138 = vmatprep.mubr.msk.bf16.mxu0 %vm354_vm0, %v327_v46 }
  0x45   : > { %1139 = vmatmul.mubr.msk.bf16.gmra.mrb[24].mxu0 %vm354_vm0, %v328_v51 }
  0x46   : > { %1142 = vmatprep.mubr.msk.bf16.mxu0 %vm354_vm0, %v329_v52 }
  0x4d   : > { %1143 = vmatmul.mubr.msk.bf16.gmra.mrb[28].mxu0 %vm354_vm0, %v330_v55 }
  0xe8   : > { %v1116_v59 = vpop.f32.mrb[0].mxu0 }
  0xe9   : > { %v446_v60 = vadd.f32 %v1116_v59, %v1368_v58  ;;  %v437_v61 = vpop.f32.mrb[1].mxu0 }
  0xea   : > { %v438_v62 = vadd.f32 %v1368_v58, %v437_v61  ;;  %v1117_v63 = vpop.f32.mrb[2].mxu0 }
  0xeb   : > { %v449_v0 = vadd.f32 %v1117_v63, %v1368_v58  ;;  %v440_v1 = vpop.f32.mrb[3].mxu0  ;;  %v566_v3 = vmax.f32 %v446_v60, 0.0 }
  0xec   : > { %v441_v2 = vadd.f32 %v1368_v58, %v440_v1  ;;  %v564_v5 = vmax.f32 %v438_v62, 0.0 }
  0xed   : > { %v567_v4 = vmax.f32 %v449_v0, 0.0 }
  0xee   : > { %v565_v6 = vmax.f32 %v441_v2, 0.0 }
  0xef   : > { %v597_v7 = vpack.c.bf16 %v567_v4, %v566_v3 }
  0xf0   : > { %v1120_v8 = vpop.f32.mrb[4].mxu0  ;;  %v596_v9 = vpack.c.bf16 %v565_v6, %v564_v5 }
  0xf1   : > { %v462_v10 = vadd.f32 %v1120_v8, %v1368_v58  ;;  %v453_v11 = vpop.f32.mrb[5].mxu0 }
  0xf2   : > { %v454_v12 = vadd.f32 %v1368_v58, %v453_v11  ;;  %v1121_v13 = vpop.f32.mrb[6].mxu0  ;;  %1162 = vmatprep.mubr.bf16.mxu1 %v596_v9 }
  0xf3   : > { %v465_v14 = vadd.f32 %v1121_v13, %v1368_v58  ;;  %v456_v15 = vpop.f32.mrb[7].mxu0  ;;  %1163 = vmatmul.mubr.bf16.vlgmr.msra.gmra.mrb[0].mxu1 %v597_v7  ;;  %v570_v17 = vmax.f32 %v462_v10, 0.0 }
  0xf4   : > { %v457_v16 = vadd.f32 %v1368_v58, %v456_v15  ;;  %v568_v19 = vmax.f32 %v454_v12, 0.0 }
  0xf5   : > { %v571_v18 = vmax.f32 %v465_v14, 0.0 }
  0xf6   : > { %v569_v20 = vmax.f32 %v457_v16, 0.0 }
  0xf7   : > { %v599_v21 = vpack.c.bf16 %v571_v18, %v570_v17 }
  0xf8   : > { %v598_v22 = vpack.c.bf16 %v569_v20, %v568_v19  ;;  %v1124_v23 = vpop.f32.mrb[8].mxu0 }
  0xf9   : > { %v478_v24 = vadd.f32 %v1124_v23, %v1368_v58  ;;  %v469_v25 = vpop.f32.mrb[9].mxu0 }
  0xfa   : > { %v470_v26 = vadd.f32 %v1368_v58, %v469_v25  ;;  %v1125_v27 = vpop.f32.mrb[10].mxu0  ;;  %1166 = vmatprep.mubr.bf16.mxu1 %v598_v22 }
  0xfb   : > { %v481_v28 = vadd.f32 %v1125_v27, %v1368_v58  ;;  %v472_v29 = vpop.f32.mrb[11].mxu0  ;;  %1167 = vmatmul.mubr.bf16.gmra.mrb[4].mxu1 %v599_v21  ;;  %v574_v31 = vmax.f32 %v478_v24, 0.0 }
  0xfc   : > { %v473_v30 = vadd.f32 %v1368_v58, %v472_v29  ;;  %v572_v33 = vmax.f32 %v470_v26, 0.0 }
  0xfd   : > { %v575_v32 = vmax.f32 %v481_v28, 0.0 }
  0xfe   : > { %v573_v34 = vmax.f32 %v473_v30, 0.0 }
  0xff   : > { %v601_v35 = vpack.c.bf16 %v575_v32, %v574_v31 }
 0x100   : > { %v600_v36 = vpack.c.bf16 %v573_v34, %v572_v33  ;;  %v1128_v37 = vpop.f32.mrb[12].mxu0 }
 0x101   : > { %v494_v38 = vadd.f32 %v1128_v37, %v1368_v58  ;;  %v485_v39 = vpop.f32.mrb[13].mxu0 }
 0x102   : > { %v486_v40 = vadd.f32 %v1368_v58, %v485_v39  ;;  %v1129_v41 = vpop.f32.mrb[14].mxu0  ;;  %1170 = vmatprep.mubr.bf16.mxu1 %v600_v36 }
 0x103   : > { %v497_v42 = vadd.f32 %v1129_v41, %v1368_v58  ;;  %v488_v43 = vpop.f32.mrb[15].mxu0  ;;  %1171 = vmatmul.mubr.bf16.gmra.mrb[8].mxu1 %v601_v35  ;;  %v578_v45 = vmax.f32 %v494_v38, 0.0 }
 0x104   : > { %v489_v44 = vadd.f32 %v1368_v58, %v488_v43  ;;  %v576_v47 = vmax.f32 %v486_v40, 0.0 }
 0x105   : > { %v579_v46 = vmax.f32 %v497_v42, 0.0 }
 0x106   : > { %v577_v48 = vmax.f32 %v489_v44, 0.0  ;;  %v1405_v44 = vld [vmem:[%s1483_s5] sm:$0xf] }
 0x107   : > { %v603_v49 = vpack.c.bf16 %v579_v46, %v578_v45  ;;  %1108 = vmatprep.mubr.bf16.mxu0 %v1405_v44  ;;  %v1411_v45 = vld [vmem:[%s1482_s4] ss:$0 sm:$0xff] }
 0x108   : > { %v602_v50 = vpack.c.bf16 %v577_v48, %v576_v47  ;;  %v1132_v51 = vpop.f32.mrb[16].mxu0 }
 0x109   : > { %v510_v52 = vadd.f32 %v1132_v51, %v1368_v58  ;;  %v501_v53 = vpop.f32.mrb[17].mxu0 }
 0x10a   : > { %v502_v54 = vadd.f32 %v1368_v58, %v501_v53  ;;  %v1133_v55 = vpop.f32.mrb[18].mxu0  ;;  %1174 = vmatprep.mubr.bf16.mxu1 %v602_v50 }
 0x10b   : > { %v513_v56 = vadd.f32 %v1133_v55, %v1368_v58  ;;  %v504_v57 = vpop.f32.mrb[19].mxu0  ;;  %1175 = vmatmul.mubr.bf16.gmra.mrb[12].mxu1 %v603_v49  ;;  %v582_v60 = vmax.f32 %v510_v52, 0.0 }
 0x10c   : > { %v505_v59 = vadd.f32 %v1368_v58, %v504_v57  ;;  %v580_v62 = vmax.f32 %v502_v54, 0.0 }
 0x10d   : > { %v583_v61 = vmax.f32 %v513_v56, 0.0 }
 0x10e   : > { %v581_v63 = vmax.f32 %v505_v59, 0.0 }
 0x10f   : > { %v605_v0 = vpack.c.bf16 %v583_v61, %v582_v60 }
 0x110   : > { %v604_v1 = vpack.c.bf16 %v581_v63, %v580_v62  ;;  %v1136_v2 = vpop.f32.mrb[20].mxu0 }
 0x111   : > { %v526_v3 = vadd.f32 %v1136_v2, %v1368_v58  ;;  %v517_v4 = vpop.f32.mrb[21].mxu0 }
 0x112   : > { %v518_v5 = vadd.f32 %v1368_v58, %v517_v4  ;;  %1178 = vmatprep.mubr.bf16.mxu1 %v604_v1  ;;  %v1137_v6 = vpop.f32.mrb[22].mxu0 }
 0x113   : > { %v586_v7 = vmax.f32 %v526_v3, 0.0  ;;  %v529_v8 = vadd.f32 %v1137_v6, %v1368_v58  ;;  %1179 = vmatmul.mubr.bf16.gmra.mrb[16].mxu1 %v605_v0  ;;  %v520_v9 = vpop.f32.mrb[23].mxu0 }
 0x114   : > { %v584_v10 = vmax.f32 %v518_v5, 0.0  ;;  %v521_v11 = vadd.f32 %v1368_v58, %v520_v9 }
 0x115   : > { %v587_v12 = vmax.f32 %v529_v8, 0.0 }
 0x116   : > { %v585_v13 = vmax.f32 %v521_v11, 0.0 }
 0x117   : > { %v607_v14 = vpack.c.bf16 %v587_v12, %v586_v7 }
 0x118   : > { %v606_v15 = vpack.c.bf16 %v585_v13, %v584_v10  ;;  %v1140_v16 = vpop.f32.mrb[24].mxu0 }
 0x119   : > { %v542_v17 = vadd.f32 %v1140_v16, %v1368_v58  ;;  %v533_v18 = vpop.f32.mrb[25].mxu0 }
 0x11a   : > { %1182 = vmatprep.mubr.bf16.mxu1 %v606_v15  ;;  %v534_v19 = vadd.f32 %v1368_v58, %v533_v18  ;;  %v1141_v20 = vpop.f32.mrb[26].mxu0 }
 0x11b   : > { %1183 = vmatmul.mubr.bf16.gmra.mrb[20].mxu1 %v607_v14  ;;  %v590_v21 = vmax.f32 %v542_v17, 0.0  ;;  %v545_v22 = vadd.f32 %v1141_v20, %v1368_v58  ;;  %v536_v23 = vpop.f32.mrb[27].mxu0 }
 0x11c   : > { %v588_v24 = vmax.f32 %v534_v19, 0.0  ;;  %v537_v25 = vadd.f32 %v1368_v58, %v536_v23 }
 0x11d   : > { %v591_v26 = vmax.f32 %v545_v22, 0.0 }
 0x11e   : > { %v589_v27 = vmax.f32 %v537_v25, 0.0 }
 0x11f   : > { %v609_v28 = vpack.c.bf16 %v591_v26, %v590_v21 }
 0x120   : > { %v608_v29 = vpack.c.bf16 %v589_v27, %v588_v24  ;;  %v1144_v30 = vpop.f32.mrb[28].mxu0 }
 0x121   : > { %v558_v31 = vadd.f32 %v1144_v30, %v1368_v58  ;;  %v549_v32 = vpop.f32.mrb[29].mxu0 }
 0x122   : > { %1186 = vmatprep.mubr.bf16.mxu1 %v608_v29  ;;  %v550_v33 = vadd.f32 %v1368_v58, %v549_v32  ;;  %v1145_v34 = vpop.f32.mrb[30].mxu0 }
 0x123   : > { %1187 = vmatmul.mubr.bf16.gmra.mrb[24].mxu1 %v609_v28  ;;  %v594_v35 = vmax.f32 %v558_v31, 0.0  ;;  %v561_v36 = vadd.f32 %v1145_v34, %v1368_v58  ;;  %v552_v37 = vpop.f32.mrb[31].mxu0 }
 0x124   : > { %v592_v38 = vmax.f32 %v550_v33, 0.0  ;;  %v553_v39 = vadd.f32 %v1368_v58, %v552_v37 }
 0x125   : > { %v595_v40 = vmax.f32 %v561_v36, 0.0 }
 0x126   : > { %v593_v41 = vmax.f32 %v553_v39, 0.0 }
 0x127   : > { %v611_v42 = vpack.c.bf16 %v595_v40, %v594_v35 }
 0x128   : > { %v610_v43 = vpack.c.bf16 %v593_v41, %v592_v38 }
 0x12a   : > { %1190 = vmatprep.mubr.bf16.mxu1 %v610_v43 }
 0x12b   : > { %1191 = vmatmul.mubr.bf16.gmra.mrb[28].mxu1 %v611_v42 }
 0x1c6   : > { %v1164_v46 = vpop.f32.mrb[0].mxu1 }
 0x1c7   : > { %v726_v58 = vadd.f32 %v1164_v46, %v1411_v45  ;;  %v717_v47 = vpop.f32.mrb[1].mxu1 }
 0x1c8   : > { %v718_v48 = vadd.f32 %v1411_v45, %v717_v47  ;;  %v1165_v49 = vpop.f32.mrb[2].mxu1 }
 0x1c9   : > { %v729_v50 = vadd.f32 %v1165_v49, %v1411_v45  ;;  %v720_v51 = vpop.f32.mrb[3].mxu1  ;;  %v846_v53 = vmax.f32 %v726_v58, 0.0 }
 0x1ca   : > { %v721_v52 = vadd.f32 %v1411_v45, %v720_v51  ;;  %v844_v55 = vmax.f32 %v718_v48, 0.0 }
 0x1cb   : > { %v847_v54 = vmax.f32 %v729_v50, 0.0 }
 0x1cc   : > { %v845_v56 = vmax.f32 %v721_v52, 0.0 }
 0x1cd   : > { %v1417_v57 = vpack.c.bf16 %v847_v54, %v846_v53 }
 0x1ce   : > { %v1419_v59 = vpack.c.bf16 %v845_v56, %v844_v55  ;;  %v1168_v60 = vpop.f32.mrb[4].mxu1 }
 0x1cf   : > { %v742_v61 = vadd.f32 %v1168_v60, %v1411_v45  ;;  %v733_v62 = vpop.f32.mrb[5].mxu1 }
 0x1d0   : > { %v734_v63 = vadd.f32 %v1411_v45, %v733_v62  ;;  %v1169_v0 = vpop.f32.mrb[6].mxu1 }
 0x1d1   : > { %v745_v1 = vadd.f32 %v1169_v0, %v1411_v45  ;;  %v736_v2 = vpop.f32.mrb[7].mxu1  ;;  %v850_v4 = vmax.f32 %v742_v61, 0.0 }
 0x1d2   : > { %v737_v3 = vadd.f32 %v1411_v45, %v736_v2  ;;  %v848_v6 = vmax.f32 %v734_v63, 0.0 }
 0x1d3   : > { %v851_v5 = vmax.f32 %v745_v1, 0.0 }
 0x1d4   : > { %v849_v7 = vmax.f32 %v737_v3, 0.0 }
 0x1d5   : > { %v1425_v8 = vpack.c.bf16 %v851_v5, %v850_v4 }
 0x1d6   : > { %v1427_v9 = vpack.c.bf16 %v849_v7, %v848_v6  ;;  %v1172_v10 = vpop.f32.mrb[8].mxu1 }
 0x1d7   : > { %v758_v11 = vadd.f32 %v1172_v10, %v1411_v45  ;;  %v749_v12 = vpop.f32.mrb[9].mxu1 }
 0x1d8   : > { %v750_v13 = vadd.f32 %v1411_v45, %v749_v12  ;;  %v1173_v14 = vpop.f32.mrb[10].mxu1 }
 0x1d9   : > { %v761_v15 = vadd.f32 %v1173_v14, %v1411_v45  ;;  %v752_v16 = vpop.f32.mrb[11].mxu1  ;;  %v854_v18 = vmax.f32 %v758_v11, 0.0 }
 0x1da   : > { %v753_v17 = vadd.f32 %v1411_v45, %v752_v16  ;;  %v852_v20 = vmax.f32 %v750_v13, 0.0 }
 0x1db   : > { %v855_v19 = vmax.f32 %v761_v15, 0.0 }
 0x1dc   : > { %v853_v21 = vmax.f32 %v753_v17, 0.0 }
 0x1dd   : > { %v1433_v22 = vpack.c.bf16 %v855_v19, %v854_v18 }
 0x1de   : > { %v1435_v23 = vpack.c.bf16 %v853_v21, %v852_v20  ;;  %v1176_v24 = vpop.f32.mrb[12].mxu1 }
 0x1df   : > { %v774_v25 = vadd.f32 %v1176_v24, %v1411_v45  ;;  %v765_v26 = vpop.f32.mrb[13].mxu1 }
 0x1e0   : > { %v766_v27 = vadd.f32 %v1411_v45, %v765_v26  ;;  %v1177_v28 = vpop.f32.mrb[14].mxu1 }
 0x1e1   : > { %v777_v29 = vadd.f32 %v1177_v28, %v1411_v45  ;;  %v768_v30 = vpop.f32.mrb[15].mxu1  ;;  %v858_v32 = vmax.f32 %v774_v25, 0.0 }
 0x1e2   : > { %v769_v31 = vadd.f32 %v1411_v45, %v768_v30  ;;  %v856_v34 = vmax.f32 %v766_v27, 0.0 }
 0x1e3   : > { %v859_v33 = vmax.f32 %v777_v29, 0.0 }
 0x1e4   : > { %v857_v35 = vmax.f32 %v769_v31, 0.0 }
 0x1e5   : > { %v1441_v36 = vpack.c.bf16 %v859_v33, %v858_v32 }
 0x1e6   : > { %v1443_v37 = vpack.c.bf16 %v857_v35, %v856_v34  ;;  %v1180_v38 = vpop.f32.mrb[16].mxu1 }
 0x1e7   : > { %v790_v39 = vadd.f32 %v1180_v38, %v1411_v45  ;;  %v781_v40 = vpop.f32.mrb[17].mxu1 }
 0x1e8   : > { %v782_v41 = vadd.f32 %v1411_v45, %v781_v40  ;;  %v1181_v42 = vpop.f32.mrb[18].mxu1 }
 0x1e9   : > { %v793_v43 = vadd.f32 %v1181_v42, %v1411_v45  ;;  %v784_v46 = vpop.f32.mrb[19].mxu1  ;;  %v862_v47 = vmax.f32 %v790_v39, 0.0 }
 0x1ea   : > { %v785_v58 = vadd.f32 %v1411_v45, %v784_v46  ;;  %v860_v49 = vmax.f32 %v782_v41, 0.0 }
 0x1eb   : > { %v863_v48 = vmax.f32 %v793_v43, 0.0 }
 0x1ec   : > { %v861_v50 = vmax.f32 %v785_v58, 0.0 }
 0x1ed   : > { %v886_v51 = vpack.c.bf16 %v863_v48, %v862_v47 }
 0x1ee   : > { %v885_v52 = vpack.c.bf16 %v861_v50, %v860_v49  ;;  %v1184_v53 = vpop.f32.mrb[20].mxu1 }
 0x1ef   : > { %v806_v54 = vadd.f32 %v1184_v53, %v1411_v45  ;;  %v797_v55 = vpop.f32.mrb[21].mxu1 }
 0x1f0   : > { %v798_v56 = vadd.f32 %v1411_v45, %v797_v55  ;;  %1092 = vmatprep.subr.bf16.mxu0 %v885_v52  ;;  %v1185_v60 = vpop.f32.mrb[22].mxu1 }
 0x1f1   : > { %v866_v61 = vmax.f32 %v806_v54, 0.0  ;;  %v809_v62 = vadd.f32 %v1185_v60, %v1411_v45  ;;  %1093 = vmatpush3.bf16.xpose.msra.mxu0 %v1419_v59  ;;  %v800_v63 = vpop.f32.mrb[23].mxu1 }
 0x1f2   : > { %v864_v0 = vmax.f32 %v798_v56, 0.0  ;;  %v801_v1 = vadd.f32 %v1411_v45, %v800_v63  ;;  %1094 = vmatprep.subr.bf16.mxu0 %v886_v51 }
 0x1f3   : > { %v867_v2 = vmax.f32 %v809_v62, 0.0 }
 0x1f4   : > { %v865_v3 = vmax.f32 %v801_v1, 0.0 }
 0x1f5   : > { %v888_v4 = vpack.c.bf16 %v867_v2, %v866_v61 }
 0x1f6   : > { %v887_v5 = vpack.c.bf16 %v865_v3, %v864_v0  ;;  %v1188_v6 = vpop.f32.mrb[24].mxu1 }
 0x1f7   : > { %v822_v7 = vadd.f32 %v1188_v6, %v1411_v45  ;;  %v813_v10 = vpop.f32.mrb[25].mxu1 }
 0x1f8   : > { %v814_v11 = vadd.f32 %v1411_v45, %v813_v10  ;;  %v1189_v12 = vpop.f32.mrb[26].mxu1 }
 0x1f9   : > { %1095 = vmatpush3.bf16.xpose.msra.mxu0 %v1417_v57  ;;  %v870_v13 = vmax.f32 %v822_v7, 0.0  ;;  %v825_v59 = vadd.f32 %v1189_v12, %v1411_v45  ;;  %v816_v14 = vpop.f32.mrb[27].mxu1 }
 0x1fa   : > { %1096 = vmatprep.subr.bf16.mxu0 %v887_v5  ;;  %v868_v15 = vmax.f32 %v814_v11, 0.0  ;;  %v817_v16 = vadd.f32 %v1411_v45, %v816_v14 }
 0x1fb   : > { %v871_v17 = vmax.f32 %v825_v59, 0.0 }
 0x1fc   : > { %v869_v18 = vmax.f32 %v817_v16, 0.0 }
 0x1fd   : > { %v890_v19 = vpack.c.bf16 %v871_v17, %v870_v13 }
 0x1fe   : > { %v889_v20 = vpack.c.bf16 %v869_v18, %v868_v15  ;;  %v1192_v21 = vpop.f32.mrb[28].mxu1 }
 0x1ff   : > { %v838_v24 = vadd.f32 %v1192_v21, %v1411_v45  ;;  %v829_v25 = vpop.f32.mrb[29].mxu1 }
 0x200   : > { %v830_v26 = vadd.f32 %v1411_v45, %v829_v25  ;;  %v1193_v27 = vpop.f32.mrb[30].mxu1 }
 0x201   : > { %1097 = vmatpush3.bf16.xpose.msra.mxu0 %v1427_v9  ;;  %v874_v57 = vmax.f32 %v838_v24, 0.0  ;;  %v841_v28 = vadd.f32 %v1193_v27, %v1411_v45  ;;  %v832_v29 = vpop.f32.mrb[31].mxu1 }
 0x202   : > { %1098 = vmatprep.subr.bf16.mxu0 %v888_v4  ;;  %v872_v30 = vmax.f32 %v830_v26, 0.0  ;;  %v833_v31 = vadd.f32 %v1411_v45, %v832_v29  ;;  %v894_v45 = vstv %s893_s13 }
 0x203   : > { %v875_v32 = vmax.f32 %v841_v28, 0.0 }
 0x204   : > { %v873_v33 = vmax.f32 %v833_v31, 0.0 }
 0x205   : > { %v892_v34 = vpack.c.bf16 %v875_v32, %v874_v57 }
 0x206   : > { %v891_v35 = vpack.c.bf16 %v873_v33, %v872_v30 }
 0x209   : > { %1099 = vmatpush3.bf16.xpose.msra.mxu0 %v1425_v8 }
 0x20a   : > { %1100 = vmatprep.subr.bf16.mxu0 %v889_v20 }
 0x211   : > { %1101 = vmatpush3.bf16.xpose.msra.mxu0 %v1435_v23 }
 0x212   : > { %1102 = vmatprep.subr.bf16.mxu0 %v890_v19 }
 0x219   : > { %1103 = vmatpush3.bf16.xpose.msra.mxu0 %v1433_v22 }
 0x21a   : > { %1104 = vmatprep.subr.bf16.mxu0 %v891_v35 }
 0x221   : > { %1105 = vmatpush3.bf16.xpose.msra.mxu0 %v1443_v37 }
 0x222   : > { %1106 = vmatprep.subr.bf16.mxu0 %v892_v34 }
 0x229   : > { %1107 = vmatpush3.bf16.xpose.msra.mxu0 %v1441_v36 }
 0x230   : > { %1109 = vmatmul.mubr.bf16.vlgmr.msra.gmra.mrb[32].mxu0 %v1405_v44 }
 0x303   : > { %v929_v9 = vpop.f32.mrb[32].mxu0 }
 0x304   : > { %v930_v38 = vadd.f32 %v929_v9, %v894_v45  ;;  %v931_v8 = vpop.f32.mrb[33].mxu0 }
 0x305   : > { %v932_v39 = vadd.f32 %v931_v8, %v894_v45  ;;  %v933_v23 = vpop.f32.mrb[34].mxu0 }
 0x306   : > { %v1045_v40 = vmul.f32 -1.442695, %v930_v38  ;;  %v934_v41 = vpop.f32.mrb[35].mxu0 }
 0x307   : > { %v1046_v22 = vmul.f32 -1.442695, %v932_v39 }
 0x308   : > { %1212 = vpow2.f32 %v1045_v40 }
 0x309   : > { %1214 = vpow2.f32 %v1046_v22 }
 0x312   : > { %v1213_v37 = vpop.eup %1212 }
 0x313   : > { %v1215_v42 = vpop.eup %1214  ;;  %v942_v43 = vadd.f32 1.0, %v1213_v37 }
 0x314   : > { %v943_v36 = vadd.f32 1.0, %v1215_v42 }
 0x315   : > { %1216 = vrcp.f32 %v942_v43 }
 0x316   : > { %1218 = vrcp.f32 %v943_v36 }
 0x31f   : > { %v1217_v44 = vpop.eup %1216 }
 0x320   : > { %v1219_v46 = vpop.eup %1218 }
 0x321   : > { %v950_v58 = vcombine.low %v1217_v44, %v1219_v46 }
 0x323   : > { %952 = vst [vmem:[%s281_s17] sm:$0xff] %v950_v58 }
 0x324 PF: > { %s18_s26 = sadd.s32 1, %s1226_s26  }
 0x325   : > { %p15_p5 = scmp.ge.s32.totalorder %s18_s26, 4  }
 0x327   :  { %17 = sbr.rel (!%p15_p5) target bundleno = 2 (0x2), region = 78 }

</bundles_post_ra>
